<compile_context>
chip_gen: v7x
topology: tpu7x:2x2x1
jax: 0.10.0
libtpu: 0.0.40
codegen_flags: <defaults>
</compile_context>

<pallas_src>
import functools

import jax
import jax.numpy as jnp
from jax.experimental import pallas as pl
from jax.experimental.pallas import tpu as pltpu


# ----------------------------- kernel helpers ------------------------------ #

def _leaky(v, slope):
    return jnp.where(v >= 0, v, slope * v)


def _pad_lanes(plane, pad):
    """Zero-extend the flattened spatial (lane) axis by `pad` on both sides."""
    z = jnp.zeros((plane.shape[0], pad), plane.dtype)
    return jnp.concatenate([z, plane, z], axis=1)


def _tap(padded, shift, pad, n, col_mask):
    """out[:, p] = plane[:, p + shift] with zero fill outside [0, n).

    `col_mask` zeroes lanes whose read would wrap across a row of the (H, W)
    grid (the horizontal part of SAME zero padding); the vertical part is
    handled by the zero fill itself.
    """
    win = padded[:, pad + shift: pad + shift + n]
    if col_mask is None:
        return win
    return jnp.where(col_mask, win, 0.0)


# ------------------------------ fused kernel ------------------------------- #

def _decoder_block_kernel(x_ref, w1_ref, b1_ref, wr1_ref, br1_ref,
                          wr2_ref, br2_ref, o_ref, *, H, W, C, Cin):
    n = H * W
    pad = max(128, W + 1)          # >=128 keeps the zero-pad concat lane-aligned

    # horizontal-validity masks on the flattened spatial axis (shared by all convs)
    w_idx = jax.lax.broadcasted_iota(jnp.int32, (1, n), 1) % W
    col_masks = {-1: w_idx >= 1, 0: None, 1: w_idx <= W - 2}

    def conv_im2col_single(plane):
        """im2col (9*Cin, n) of a 3x3 SAME conv over one (Cin, H*W) plane."""
        padded = _pad_lanes(plane, pad)
        taps = [_tap(padded, dy * W + dx, pad, n, col_masks[dx])
                for dy in (-1, 0, 1) for dx in (-1, 0, 1)]
        return jnp.concatenate(taps, axis=0)

    def conv_on_subplanes(planes, wf, bias):
        """3x3 SAME conv over the 2H x 2W image stored as 4 (C, H*W) sub-planes.

        Sub-pixel decomposition: output sub-plane (i, j) gathers each tap from the
        appropriate source sub-plane shifted by 0/+-1 on the low-res grid, so every
        output sub-plane is a single K=9*C matmul with H*W on lanes.
        """
        padded = [_pad_lanes(p, pad) for p in planes]
        outs = []
        for i in (0, 1):
            for j in (0, 1):
                taps = []
                for dy in (-1, 0, 1):
                    ii, sy = (i + dy) % 2, (i + dy) // 2
                    for dx in (-1, 0, 1):
                        jj, sx = (j + dx) % 2, (j + dx) // 2
                        taps.append(_tap(padded[2 * ii + jj],
                                         sy * W + sx, pad, n, col_masks[sx]))
                col = jnp.concatenate(taps, axis=0)                      # (9*C, n)
                outs.append(jnp.dot(wf, col,
                                    preferred_element_type=jnp.float32) + bias)
        return outs

    x = x_ref[0].astype(jnp.float32)                                     # (Cin, n)

    # stage 1: conv(Cin -> 4*C) + LeakyReLU(0.1), single K=9*Cin matmul.
    # f32 MXU operands keep us inside the 1e-4 reference tolerance (bf16 operands
    # + f32 accumulation is the v5e/v6e fast path when tolerances allow).
    col1 = conv_im2col_single(x)                                         # (9*Cin, n)
    y1 = jnp.dot(w1_ref[...], col1,
                 preferred_element_type=jnp.float32) + b1_ref[...]       # (4*C, n)
    y1 = _leaky(y1, 0.1)

    # pixel_shuffle(2): rows of y1 are already (sub-plane, channel)-major, so the
    # shuffled image is just the four contiguous row groups -- no data movement.
    ident = [y1[s * C:(s + 1) * C, :] for s in range(4)]                 # 4 x (C, n)

    # residual conv 1 + LeakyReLU(0.2)
    r = conv_on_subplanes(ident, wr1_ref[...], br1_ref[...])
    r = [_leaky(t, 0.2) for t in r]

    # residual conv 2, add identity, LeakyReLU(0.2), lane-dense store
    r2 = conv_on_subplanes(r, wr2_ref[...], br2_ref[...])
    for s in range(4):
        o_ref[0, s] = _leaky(ident[s] + r2[s], 0.2).astype(o_ref.dtype)


# ------------------------------- wrapper ------------------------------------ #

def _flatten_hwio(w):
    """(3, 3, Cin, Cout) HWIO -> (Cout, 9*Cin), rows ordered tap-major then cin."""
    kh, kw, cin, cout = w.shape
    return jnp.transpose(w, (3, 0, 1, 2)).reshape(cout, kh * kw * cin)


def _subplane_major(w_flat, bias, C):
    """Reorder conv1 outputs from PyTorch's c*4 + (2i+j) to (2i+j)*C + c."""
    cout, kk = w_flat.shape
    w_flat = jnp.transpose(w_flat.reshape(C, 4, kk), (1, 0, 2)).reshape(4 * C, kk)
    bias = jnp.transpose(bias.reshape(C, 4), (1, 0)).reshape(4 * C)
    return w_flat, bias


def decoder_block_forward(x_nchw, params):
    """Full DecoderBlock forward. Input/output are NCHW like the PyTorch module."""
    N, Cin, H, W = x_nchw.shape
    C = params["w1"].shape[-1] // 4
    n = H * W

    # weight/bias plumbing (tiny, fused by XLA around the kernel)
    w1f, b1f = _subplane_major(_flatten_hwio(params["w1"]), params["b1"], C)
    b1f = b1f.reshape(4 * C, 1)
    wr1f = _flatten_hwio(params["wr1"]); br1f = params["br1"].reshape(C, 1)
    wr2f = _flatten_hwio(params["wr2"]); br2f = params["br2"].reshape(C, 1)

    x_flat = x_nchw.reshape(N, Cin, n)          # contiguous reshape, no transpose

    kernel = functools.partial(_decoder_block_kernel, H=H, W=W, C=C, Cin=Cin)
    out = pl.pallas_call(
        kernel,
        out_shape=jax.ShapeDtypeStruct((N, 4, C, n), x_nchw.dtype),
        grid=(N,),
        in_specs=[
            pl.BlockSpec((1, Cin, n), lambda b: (b, 0, 0)),
            pl.BlockSpec((4 * C, 9 * Cin), lambda b: (0, 0)),
            pl.BlockSpec((4 * C, 1), lambda b: (0, 0)),
            pl.BlockSpec((C, 9 * C), lambda b: (0, 0)),
            pl.BlockSpec((C, 1), lambda b: (0, 0)),
            pl.BlockSpec((C, 9 * C), lambda b: (0, 0)),
            pl.BlockSpec((C, 1), lambda b: (0, 0)),
        ],
        out_specs=pl.BlockSpec((1, 4, C, n), lambda b: (b, 0, 0, 0)),
        compiler_params=pltpu.CompilerParams(dimension_semantics=("parallel",)),
    )(x_flat, w1f, b1f, wr1f, br1f, wr2f, br2f)

    # interleave the 4 sub-planes back to NCHW (only layout op left; a few KiB)
    out = out.reshape(N, 2, 2, C, H, W)
    out = jnp.transpose(out, (0, 3, 4, 1, 5, 2))
    return out.reshape(N, C, 2 * H, 2 * W)


# ------------------------- Reference (plain JAX) --------------------------- #

def _ref_conv(x, w, b):
    y = jax.lax.conv_general_dilated(
        x, w, window_strides=(1, 1), padding="SAME",
        dimension_numbers=("NHWC", "HWIO", "NHWC"))
    return y + b[None, None, None, :]


def pixel_shuffle_nhwc(x, r):
    N, H, W, CRR = x.shape
    C = CRR // (r * r)
    x = x.reshape(N, H, W, C, r, r)
    x = jnp.transpose(x, (0, 1, 4, 2, 5, 3))
    return x.reshape(N, H * r, W * r, C)


def decoder_block_reference(x_nchw, params):
    x = jnp.transpose(x_nchw, (0, 2, 3, 1))
    x = _leaky(_ref_conv(x, params["w1"], params["b1"]), 0.1)
    x = pixel_shuffle_nhwc(x, 2)
    identity = x
    r = _leaky(_ref_conv(x, params["wr1"], params["br1"]), 0.2)
    r = _ref_conv(r, params["wr2"], params["br2"])
    x = _leaky(identity + r, 0.2)
    return jnp.transpose(x, (0, 3, 1, 2))


# --------------------------------- Main ------------------------------------ #

def _init_conv(key, cin, cout, k=3):
    """Deterministic PyTorch-like uniform init; returns HWIO weight + bias."""
    kw, kb = jax.random.split(key)
    bound = 1.0 / jnp.sqrt(cin * k * k)
    w = jax.random.uniform(kw, (k, k, cin, cout), jnp.float32, -bound, bound)
    b = jax.random.uniform(kb, (cout,), jnp.float32, -bound, bound)
    return w, b


if __name__ == "__main__":
    in_channels, out_channels = 4, 4
    N, H, W = 2, 16, 16

    key = jax.random.PRNGKey(0)
    k_x, k1, k2, k3 = jax.random.split(key, 4)

    w1, b1 = _init_conv(k1, in_channels, out_channels * 4)      # self.conv
    wr1, br1 = _init_conv(k2, out_channels, out_channels)       # residual[0]
    wr2, br2 = _init_conv(k3, out_channels, out_channels)       # residual[2]
    params = dict(w1=w1, b1=b1, wr1=wr1, br1=br1, wr2=wr2, br2=br2)

    x = jax.random.normal(k_x, (N, in_channels, H, W), jnp.float32)  # NCHW like PyTorch

    fwd = jax.jit(decoder_block_forward)
    out = jax.block_until_ready(fwd(x, params))
    ref = jax.block_until_ready(decoder_block_reference(x, params))

    assert out.shape == (N, out_channels, 2 * H, 2 * W), out.shape
    assert jnp.allclose(out, ref, atol=1e-4, rtol=1e-4), float(jnp.max(jnp.abs(out - ref)))

    print("KERNEL_OK")
</pallas_src>

<mosaic_0001>
module attributes {stable_mosaic.version = 11 : i64} {
  func.func @_decoder_block_kernel(%arg0: i32, %arg1: memref<1x4x256xf32, #tpu.memory_space<vmem>>, %arg2: memref<16x36xf32, #tpu.memory_space<vmem>>, %arg3: memref<16x1xf32, #tpu.memory_space<vmem>>, %arg4: memref<4x36xf32, #tpu.memory_space<vmem>>, %arg5: memref<4x1xf32, #tpu.memory_space<vmem>>, %arg6: memref<4x36xf32, #tpu.memory_space<vmem>>, %arg7: memref<4x1xf32, #tpu.memory_space<vmem>>, %arg8: memref<1x4x4x256xf32, #tpu.memory_space<vmem>>) attributes {dimension_semantics = [#tpu.dimension_semantics<parallel>], iteration_bounds = array<i64: 2>, scalar_prefetch = 0 : i64, scratch_operands = 0 : i64, tpu.core_type = #tpu.core_type<tc>, window_params = [{transform_indices = @transform_0, window_bounds = array<i64: 1, 4, 256>}, {pipeline_mode = #tpu.pipeline_mode<synchronous>, transform_indices = @transform_1, window_bounds = array<i64: 16, 36>}, {pipeline_mode = #tpu.pipeline_mode<synchronous>, transform_indices = @transform_2, window_bounds = array<i64: 16, 1>}, {pipeline_mode = #tpu.pipeline_mode<synchronous>, transform_indices = @transform_3, window_bounds = array<i64: 4, 36>}, {pipeline_mode = #tpu.pipeline_mode<synchronous>, transform_indices = @transform_4, window_bounds = array<i64: 4, 1>}, {pipeline_mode = #tpu.pipeline_mode<synchronous>, transform_indices = @transform_5, window_bounds = array<i64: 4, 36>}, {pipeline_mode = #tpu.pipeline_mode<synchronous>, transform_indices = @transform_6, window_bounds = array<i64: 4, 1>}, {transform_indices = @transform_7, window_bounds = array<i64: 1, 4, 4, 256>}]} {
    %0 = tpu.iota {dimensions = array<i32: 1>} : vector<1x256xi32>
    %c16_i32 = arith.constant 16 : i32
    %c0_i32 = arith.constant 0 : i32
    %1 = arith.cmpi eq, %c16_i32, %c0_i32 : i32
    %c1_i32 = arith.constant 1 : i32
    %2 = arith.select %1, %c1_i32, %c16_i32 : i32
    %3 = vector.broadcast %2 : i32 to vector<1x256xi32>
    %4 = arith.remsi %0, %3 : vector<1x256xi32>
    %c0_i32_0 = arith.constant 0 : i32
    %5 = vector.broadcast %c0_i32_0 : i32 to vector<1x256xi32>
    %6 = arith.cmpi ne, %4, %5 : vector<1x256xi32>
    %c0_i32_1 = arith.constant 0 : i32
    %7 = vector.broadcast %c0_i32_1 : i32 to vector<1x256xi32>
    %8 = arith.cmpi slt, %4, %7 : vector<1x256xi32>
    %c0_i32_2 = arith.constant 0 : i32
    %9 = arith.cmpi slt, %2, %c0_i32_2 : i32
    %10 = vector.broadcast %9 : i1 to vector<1x256xi1>
    %11 = vector.broadcast %10 : vector<1x256xi1> to vector<1x256xi1>
    %12 = arith.xori %8, %11 : vector<1x256xi1>
    %13 = arith.andi %12, %6 : vector<1x256xi1>
    %14 = vector.broadcast %2 : i32 to vector<1x256xi32>
    %15 = arith.addi %4, %14 : vector<1x256xi32>
    %16 = arith.select %13, %15, %4 : vector<1x256xi1>, vector<1x256xi32>
    %c1_i32_3 = arith.constant 1 : i32
    %17 = vector.broadcast %c1_i32_3 : i32 to vector<1x256xi32>
    %18 = arith.cmpi sge, %16, %17 : vector<1x256xi32>
    %c14_i32 = arith.constant 14 : i32
    %19 = vector.broadcast %c14_i32 : i32 to vector<1x256xi32>
    %20 = arith.cmpi sle, %16, %19 : vector<1x256xi32>
    %c0 = arith.constant 0 : index
    %c0_4 = arith.constant 0 : index
    %c0_5 = arith.constant 0 : index
    %21 = vector.load %arg1[%c0, %c0_4, %c0_5] : memref<1x4x256xf32, #tpu.memory_space<vmem>>, vector<1x4x256xf32>
    %22 = vector.shape_cast %21 : vector<1x4x256xf32> to vector<4x256xf32>
    %cst = arith.constant 0.000000e+00 : f32
    %23 = vector.broadcast %cst : f32 to vector<4x128xf32>
    %24 = tpu.concatenate %23, %22, %23 in 1 : vector<4x128xf32>, vector<4x256xf32>, vector<4x128xf32> -> vector<4x512xf32>
    %25 = vector.extract_strided_slice %24 {offsets = [0, 111], sizes = [4, 256], strides = [1, 1]} : vector<4x512xf32> to vector<4x256xf32>
    %cst_6 = arith.constant 0.000000e+00 : f32
    %26 = vector.shape_cast %18 : vector<1x256xi1> to vector<1x256xi1>
    %27 = vector.broadcast %26 : vector<1x256xi1> to vector<4x256xi1>
    %28 = vector.broadcast %cst_6 : f32 to vector<4x256xf32>
    %29 = arith.select %27, %25, %28 : vector<4x256xi1>, vector<4x256xf32>
    %30 = vector.extract_strided_slice %24 {offsets = [0, 112], sizes = [4, 256], strides = [1, 1]} : vector<4x512xf32> to vector<4x256xf32>
    %31 = vector.extract_strided_slice %24 {offsets = [0, 113], sizes = [4, 256], strides = [1, 1]} : vector<4x512xf32> to vector<4x256xf32>
    %cst_7 = arith.constant 0.000000e+00 : f32
    %32 = vector.shape_cast %20 : vector<1x256xi1> to vector<1x256xi1>
    %33 = vector.broadcast %32 : vector<1x256xi1> to vector<4x256xi1>
    %34 = vector.broadcast %cst_7 : f32 to vector<4x256xf32>
    %35 = arith.select %33, %31, %34 : vector<4x256xi1>, vector<4x256xf32>
    %36 = vector.extract_strided_slice %24 {offsets = [0, 127], sizes = [4, 256], strides = [1, 1]} : vector<4x512xf32> to vector<4x256xf32>
    %cst_8 = arith.constant 0.000000e+00 : f32
    %37 = vector.shape_cast %18 : vector<1x256xi1> to vector<1x256xi1>
    %38 = vector.broadcast %37 : vector<1x256xi1> to vector<4x256xi1>
    %39 = vector.broadcast %cst_8 : f32 to vector<4x256xf32>
    %40 = arith.select %38, %36, %39 : vector<4x256xi1>, vector<4x256xf32>
    %41 = vector.extract_strided_slice %24 {offsets = [0, 128], sizes = [4, 256], strides = [1, 1]} : vector<4x512xf32> to vector<4x256xf32>
    %42 = vector.extract_strided_slice %24 {offsets = [0, 129], sizes = [4, 256], strides = [1, 1]} : vector<4x512xf32> to vector<4x256xf32>
    %cst_9 = arith.constant 0.000000e+00 : f32
    %43 = vector.shape_cast %20 : vector<1x256xi1> to vector<1x256xi1>
    %44 = vector.broadcast %43 : vector<1x256xi1> to vector<4x256xi1>
    %45 = vector.broadcast %cst_9 : f32 to vector<4x256xf32>
    %46 = arith.select %44, %42, %45 : vector<4x256xi1>, vector<4x256xf32>
    %47 = vector.extract_strided_slice %24 {offsets = [0, 143], sizes = [4, 256], strides = [1, 1]} : vector<4x512xf32> to vector<4x256xf32>
    %cst_10 = arith.constant 0.000000e+00 : f32
    %48 = vector.shape_cast %18 : vector<1x256xi1> to vector<1x256xi1>
    %49 = vector.broadcast %48 : vector<1x256xi1> to vector<4x256xi1>
    %50 = vector.broadcast %cst_10 : f32 to vector<4x256xf32>
    %51 = arith.select %49, %47, %50 : vector<4x256xi1>, vector<4x256xf32>
    %52 = vector.extract_strided_slice %24 {offsets = [0, 144], sizes = [4, 256], strides = [1, 1]} : vector<4x512xf32> to vector<4x256xf32>
    %53 = vector.extract_strided_slice %24 {offsets = [0, 145], sizes = [4, 256], strides = [1, 1]} : vector<4x512xf32> to vector<4x256xf32>
    %cst_11 = arith.constant 0.000000e+00 : f32
    %54 = vector.shape_cast %20 : vector<1x256xi1> to vector<1x256xi1>
    %55 = vector.broadcast %54 : vector<1x256xi1> to vector<4x256xi1>
    %56 = vector.broadcast %cst_11 : f32 to vector<4x256xf32>
    %57 = arith.select %55, %53, %56 : vector<4x256xi1>, vector<4x256xf32>
    %58 = tpu.concatenate %29, %30, %35, %40, %41, %46, %51, %52, %57 in 0 : vector<4x256xf32>, vector<4x256xf32>, vector<4x256xf32>, vector<4x256xf32>, vector<4x256xf32>, vector<4x256xf32>, vector<4x256xf32>, vector<4x256xf32>, vector<4x256xf32> -> vector<36x256xf32>
    %c0_12 = arith.constant 0 : index
    %c0_13 = arith.constant 0 : index
    %59 = vector.load %arg2[%c0_12, %c0_13] : memref<16x36xf32, #tpu.memory_space<vmem>>, vector<16x36xf32>
    %cst_14 = arith.constant dense<0.000000e+00> : vector<16x256xf32>
    %60 = tpu.matmul %59, %58, %cst_14 {dimension_numbers = #tpu.dot_dimension_numbers<[1], [0], [0], [1], [0, 0, 1, 1], [], []>} : vector<16x36xf32>, vector<36x256xf32>, vector<16x256xf32> -> vector<16x256xf32>
    %c0_15 = arith.constant 0 : index
    %c0_16 = arith.constant 0 : index
    %61 = vector.load %arg3[%c0_15, %c0_16] : memref<16x1xf32, #tpu.memory_space<vmem>>, vector<16x1xf32>
    %62 = vector.broadcast %61 : vector<16x1xf32> to vector<16x256xf32>
    %63 = arith.addf %60, %62 : vector<16x256xf32>
    %cst_17 = arith.constant 0.000000e+00 : f32
    %64 = vector.broadcast %cst_17 : f32 to vector<16x256xf32>
    %65 = arith.cmpf oge, %63, %64 : vector<16x256xf32>
    %cst_18 = arith.constant 1.000000e-01 : f32
    %66 = vector.broadcast %cst_18 : f32 to vector<16x256xf32>
    %67 = arith.mulf %66, %63 : vector<16x256xf32>
    %68 = arith.select %65, %63, %67 : vector<16x256xi1>, vector<16x256xf32>
    %69 = vector.extract_strided_slice %68 {offsets = [0, 0], sizes = [4, 256], strides = [1, 1]} : vector<16x256xf32> to vector<4x256xf32>
    %70 = vector.extract_strided_slice %68 {offsets = [4, 0], sizes = [4, 256], strides = [1, 1]} : vector<16x256xf32> to vector<4x256xf32>
    %71 = vector.extract_strided_slice %68 {offsets = [8, 0], sizes = [4, 256], strides = [1, 1]} : vector<16x256xf32> to vector<4x256xf32>
    %72 = vector.extract_strided_slice %68 {offsets = [12, 0], sizes = [4, 256], strides = [1, 1]} : vector<16x256xf32> to vector<4x256xf32>
    %c0_19 = arith.constant 0 : index
    %c0_20 = arith.constant 0 : index
    %73 = vector.load %arg4[%c0_19, %c0_20] : memref<4x36xf32, #tpu.memory_space<vmem>>, vector<4x36xf32>
    %c0_21 = arith.constant 0 : index
    %c0_22 = arith.constant 0 : index
    %74 = vector.load %arg5[%c0_21, %c0_22] : memref<4x1xf32, #tpu.memory_space<vmem>>, vector<4x1xf32>
    %cst_23 = arith.constant 0.000000e+00 : f32
    %75 = vector.broadcast %cst_23 : f32 to vector<4x128xf32>
    %76 = tpu.concatenate %75, %69, %75 in 1 : vector<4x128xf32>, vector<4x256xf32>, vector<4x128xf32> -> vector<4x512xf32>
    %cst_24 = arith.constant 0.000000e+00 : f32
    %77 = vector.broadcast %cst_24 : f32 to vector<4x128xf32>
    %78 = tpu.concatenate %77, %70, %77 in 1 : vector<4x128xf32>, vector<4x256xf32>, vector<4x128xf32> -> vector<4x512xf32>
    %cst_25 = arith.constant 0.000000e+00 : f32
    %79 = vector.broadcast %cst_25 : f32 to vector<4x128xf32>
    %80 = tpu.concatenate %79, %71, %79 in 1 : vector<4x128xf32>, vector<4x256xf32>, vector<4x128xf32> -> vector<4x512xf32>
    %cst_26 = arith.constant 0.000000e+00 : f32
    %81 = vector.broadcast %cst_26 : f32 to vector<4x128xf32>
    %82 = tpu.concatenate %81, %72, %81 in 1 : vector<4x128xf32>, vector<4x256xf32>, vector<4x128xf32> -> vector<4x512xf32>
    %83 = vector.extract_strided_slice %82 {offsets = [0, 111], sizes = [4, 256], strides = [1, 1]} : vector<4x512xf32> to vector<4x256xf32>
    %cst_27 = arith.constant 0.000000e+00 : f32
    %84 = vector.shape_cast %18 : vector<1x256xi1> to vector<1x256xi1>
    %85 = vector.broadcast %84 : vector<1x256xi1> to vector<4x256xi1>
    %86 = vector.broadcast %cst_27 : f32 to vector<4x256xf32>
    %87 = arith.select %85, %83, %86 : vector<4x256xi1>, vector<4x256xf32>
    %88 = vector.extract_strided_slice %80 {offsets = [0, 112], sizes = [4, 256], strides = [1, 1]} : vector<4x512xf32> to vector<4x256xf32>
    %89 = vector.extract_strided_slice %82 {offsets = [0, 112], sizes = [4, 256], strides = [1, 1]} : vector<4x512xf32> to vector<4x256xf32>
    %90 = vector.extract_strided_slice %78 {offsets = [0, 127], sizes = [4, 256], strides = [1, 1]} : vector<4x512xf32> to vector<4x256xf32>
    %cst_28 = arith.constant 0.000000e+00 : f32
    %91 = vector.shape_cast %18 : vector<1x256xi1> to vector<1x256xi1>
    %92 = vector.broadcast %91 : vector<1x256xi1> to vector<4x256xi1>
    %93 = vector.broadcast %cst_28 : f32 to vector<4x256xf32>
    %94 = arith.select %92, %90, %93 : vector<4x256xi1>, vector<4x256xf32>
    %95 = vector.extract_strided_slice %76 {offsets = [0, 128], sizes = [4, 256], strides = [1, 1]} : vector<4x512xf32> to vector<4x256xf32>
    %96 = vector.extract_strided_slice %78 {offsets = [0, 128], sizes = [4, 256], strides = [1, 1]} : vector<4x512xf32> to vector<4x256xf32>
    %97 = vector.extract_strided_slice %82 {offsets = [0, 127], sizes = [4, 256], strides = [1, 1]} : vector<4x512xf32> to vector<4x256xf32>
    %cst_29 = arith.constant 0.000000e+00 : f32
    %98 = vector.shape_cast %18 : vector<1x256xi1> to vector<1x256xi1>
    %99 = vector.broadcast %98 : vector<1x256xi1> to vector<4x256xi1>
    %100 = vector.broadcast %cst_29 : f32 to vector<4x256xf32>
    %101 = arith.select %99, %97, %100 : vector<4x256xi1>, vector<4x256xf32>
    %102 = vector.extract_strided_slice %80 {offsets = [0, 128], sizes = [4, 256], strides = [1, 1]} : vector<4x512xf32> to vector<4x256xf32>
    %103 = vector.extract_strided_slice %82 {offsets = [0, 128], sizes = [4, 256], strides = [1, 1]} : vector<4x512xf32> to vector<4x256xf32>
    %104 = tpu.concatenate %87, %88, %89, %94, %95, %96, %101, %102, %103 in 0 : vector<4x256xf32>, vector<4x256xf32>, vector<4x256xf32>, vector<4x256xf32>, vector<4x256xf32>, vector<4x256xf32>, vector<4x256xf32>, vector<4x256xf32>, vector<4x256xf32> -> vector<36x256xf32>
    %cst_30 = arith.constant dense<0.000000e+00> : vector<4x256xf32>
    %105 = tpu.matmul %73, %104, %cst_30 {dimension_numbers = #tpu.dot_dimension_numbers<[1], [0], [0], [1], [0, 0, 1, 1], [], []>} : vector<4x36xf32>, vector<36x256xf32>, vector<4x256xf32> -> vector<4x256xf32>
    %106 = vector.broadcast %74 : vector<4x1xf32> to vector<4x256xf32>
    %107 = arith.addf %105, %106 : vector<4x256xf32>
    %108 = vector.extract_strided_slice %80 {offsets = [0, 112], sizes = [4, 256], strides = [1, 1]} : vector<4x512xf32> to vector<4x256xf32>
    %109 = vector.extract_strided_slice %82 {offsets = [0, 112], sizes = [4, 256], strides = [1, 1]} : vector<4x512xf32> to vector<4x256xf32>
    %110 = vector.extract_strided_slice %80 {offsets = [0, 113], sizes = [4, 256], strides = [1, 1]} : vector<4x512xf32> to vector<4x256xf32>
    %cst_31 = arith.constant 0.000000e+00 : f32
    %111 = vector.shape_cast %20 : vector<1x256xi1> to vector<1x256xi1>
    %112 = vector.broadcast %111 : vector<1x256xi1> to vector<4x256xi1>
    %113 = vector.broadcast %cst_31 : f32 to vector<4x256xf32>
    %114 = arith.select %112, %110, %113 : vector<4x256xi1>, vector<4x256xf32>
    %115 = vector.extract_strided_slice %76 {offsets = [0, 128], sizes = [4, 256], strides = [1, 1]} : vector<4x512xf32> to vector<4x256xf32>
    %116 = vector.extract_strided_slice %78 {offsets = [0, 128], sizes = [4, 256], strides = [1, 1]} : vector<4x512xf32> to vector<4x256xf32>
    %117 = vector.extract_strided_slice %76 {offsets = [0, 129], sizes = [4, 256], strides = [1, 1]} : vector<4x512xf32> to vector<4x256xf32>
    %cst_32 = arith.constant 0.000000e+00 : f32
    %118 = vector.shape_cast %20 : vector<1x256xi1> to vector<1x256xi1>
    %119 = vector.broadcast %118 : vector<1x256xi1> to vector<4x256xi1>
    %120 = vector.broadcast %cst_32 : f32 to vector<4x256xf32>
    %121 = arith.select %119, %117, %120 : vector<4x256xi1>, vector<4x256xf32>
    %122 = vector.extract_strided_slice %80 {offsets = [0, 128], sizes = [4, 256], strides = [1, 1]} : vector<4x512xf32> to vector<4x256xf32>
    %123 = vector.extract_strided_slice %82 {offsets = [0, 128], sizes = [4, 256], strides = [1, 1]} : vector<4x512xf32> to vector<4x256xf32>
    %124 = vector.extract_strided_slice %80 {offsets = [0, 129], sizes = [4, 256], strides = [1, 1]} : vector<4x512xf32> to vector<4x256xf32>
    %cst_33 = arith.constant 0.000000e+00 : f32
    %125 = vector.shape_cast %20 : vector<1x256xi1> to vector<1x256xi1>
    %126 = vector.broadcast %125 : vector<1x256xi1> to vector<4x256xi1>
    %127 = vector.broadcast %cst_33 : f32 to vector<4x256xf32>
    %128 = arith.select %126, %124, %127 : vector<4x256xi1>, vector<4x256xf32>
    %129 = tpu.concatenate %108, %109, %114, %115, %116, %121, %122, %123, %128 in 0 : vector<4x256xf32>, vector<4x256xf32>, vector<4x256xf32>, vector<4x256xf32>, vector<4x256xf32>, vector<4x256xf32>, vector<4x256xf32>, vector<4x256xf32>, vector<4x256xf32> -> vector<36x256xf32>
    %cst_34 = arith.constant dense<0.000000e+00> : vector<4x256xf32>
    %130 = tpu.matmul %73, %129, %cst_34 {dimension_numbers = #tpu.dot_dimension_numbers<[1], [0], [0], [1], [0, 0, 1, 1], [], []>} : vector<4x36xf32>, vector<36x256xf32>, vector<4x256xf32> -> vector<4x256xf32>
    %131 = vector.broadcast %74 : vector<4x1xf32> to vector<4x256xf32>
    %132 = arith.addf %130, %131 : vector<4x256xf32>
    %133 = vector.extract_strided_slice %78 {offsets = [0, 127], sizes = [4, 256], strides = [1, 1]} : vector<4x512xf32> to vector<4x256xf32>
    %cst_35 = arith.constant 0.000000e+00 : f32
    %134 = vector.shape_cast %18 : vector<1x256xi1> to vector<1x256xi1>
    %135 = vector.broadcast %134 : vector<1x256xi1> to vector<4x256xi1>
    %136 = vector.broadcast %cst_35 : f32 to vector<4x256xf32>
    %137 = arith.select %135, %133, %136 : vector<4x256xi1>, vector<4x256xf32>
    %138 = vector.extract_strided_slice %76 {offsets = [0, 128], sizes = [4, 256], strides = [1, 1]} : vector<4x512xf32> to vector<4x256xf32>
    %139 = vector.extract_strided_slice %78 {offsets = [0, 128], sizes = [4, 256], strides = [1, 1]} : vector<4x512xf32> to vector<4x256xf32>
    %140 = vector.extract_strided_slice %82 {offsets = [0, 127], sizes = [4, 256], strides = [1, 1]} : vector<4x512xf32> to vector<4x256xf32>
    %cst_36 = arith.constant 0.000000e+00 : f32
    %141 = vector.shape_cast %18 : vector<1x256xi1> to vector<1x256xi1>
    %142 = vector.broadcast %141 : vector<1x256xi1> to vector<4x256xi1>
    %143 = vector.broadcast %cst_36 : f32 to vector<4x256xf32>
    %144 = arith.select %142, %140, %143 : vector<4x256xi1>, vector<4x256xf32>
    %145 = vector.extract_strided_slice %80 {offsets = [0, 128], sizes = [4, 256], strides = [1, 1]} : vector<4x512xf32> to vector<4x256xf32>
    %146 = vector.extract_strided_slice %82 {offsets = [0, 128], sizes = [4, 256], strides = [1, 1]} : vector<4x512xf32> to vector<4x256xf32>
    %147 = vector.extract_strided_slice %78 {offsets = [0, 143], sizes = [4, 256], strides = [1, 1]} : vector<4x512xf32> to vector<4x256xf32>
    %cst_37 = arith.constant 0.000000e+00 : f32
    %148 = vector.shape_cast %18 : vector<1x256xi1> to vector<1x256xi1>
    %149 = vector.broadcast %148 : vector<1x256xi1> to vector<4x256xi1>
    %150 = vector.broadcast %cst_37 : f32 to vector<4x256xf32>
    %151 = arith.select %149, %147, %150 : vector<4x256xi1>, vector<4x256xf32>
    %152 = vector.extract_strided_slice %76 {offsets = [0, 144], sizes = [4, 256], strides = [1, 1]} : vector<4x512xf32> to vector<4x256xf32>
    %153 = vector.extract_strided_slice %78 {offsets = [0, 144], sizes = [4, 256], strides = [1, 1]} : vector<4x512xf32> to vector<4x256xf32>
    %154 = tpu.concatenate %137, %138, %139, %144, %145, %146, %151, %152, %153 in 0 : vector<4x256xf32>, vector<4x256xf32>, vector<4x256xf32>, vector<4x256xf32>, vector<4x256xf32>, vector<4x256xf32>, vector<4x256xf32>, vector<4x256xf32>, vector<4x256xf32> -> vector<36x256xf32>
    %cst_38 = arith.constant dense<0.000000e+00> : vector<4x256xf32>
    %155 = tpu.matmul %73, %154, %cst_38 {dimension_numbers = #tpu.dot_dimension_numbers<[1], [0], [0], [1], [0, 0, 1, 1], [], []>} : vector<4x36xf32>, vector<36x256xf32>, vector<4x256xf32> -> vector<4x256xf32>
    %156 = vector.broadcast %74 : vector<4x1xf32> to vector<4x256xf32>
    %157 = arith.addf %155, %156 : vector<4x256xf32>
    %158 = vector.extract_strided_slice %76 {offsets = [0, 128], sizes = [4, 256], strides = [1, 1]} : vector<4x512xf32> to vector<4x256xf32>
    %159 = vector.extract_strided_slice %78 {offsets = [0, 128], sizes = [4, 256], strides = [1, 1]} : vector<4x512xf32> to vector<4x256xf32>
    %160 = vector.extract_strided_slice %76 {offsets = [0, 129], sizes = [4, 256], strides = [1, 1]} : vector<4x512xf32> to vector<4x256xf32>
    %cst_39 = arith.constant 0.000000e+00 : f32
    %161 = vector.shape_cast %20 : vector<1x256xi1> to vector<1x256xi1>
    %162 = vector.broadcast %161 : vector<1x256xi1> to vector<4x256xi1>
    %163 = vector.broadcast %cst_39 : f32 to vector<4x256xf32>
    %164 = arith.select %162, %160, %163 : vector<4x256xi1>, vector<4x256xf32>
    %165 = vector.extract_strided_slice %80 {offsets = [0, 128], sizes = [4, 256], strides = [1, 1]} : vector<4x512xf32> to vector<4x256xf32>
    %166 = vector.extract_strided_slice %82 {offsets = [0, 128], sizes = [4, 256], strides = [1, 1]} : vector<4x512xf32> to vector<4x256xf32>
    %167 = vector.extract_strided_slice %80 {offsets = [0, 129], sizes = [4, 256], strides = [1, 1]} : vector<4x512xf32> to vector<4x256xf32>
    %cst_40 = arith.constant 0.000000e+00 : f32
    %168 = vector.shape_cast %20 : vector<1x256xi1> to vector<1x256xi1>
    %169 = vector.broadcast %168 : vector<1x256xi1> to vector<4x256xi1>
    %170 = vector.broadcast %cst_40 : f32 to vector<4x256xf32>
    %171 = arith.select %169, %167, %170 : vector<4x256xi1>, vector<4x256xf32>
    %172 = vector.extract_strided_slice %76 {offsets = [0, 144], sizes = [4, 256], strides = [1, 1]} : vector<4x512xf32> to vector<4x256xf32>
    %173 = vector.extract_strided_slice %78 {offsets = [0, 144], sizes = [4, 256], strides = [1, 1]} : vector<4x512xf32> to vector<4x256xf32>
    %174 = vector.extract_strided_slice %76 {offsets = [0, 145], sizes = [4, 256], strides = [1, 1]} : vector<4x512xf32> to vector<4x256xf32>
    %cst_41 = arith.constant 0.000000e+00 : f32
    %175 = vector.shape_cast %20 : vector<1x256xi1> to vector<1x256xi1>
    %176 = vector.broadcast %175 : vector<1x256xi1> to vector<4x256xi1>
    %177 = vector.broadcast %cst_41 : f32 to vector<4x256xf32>
    %178 = arith.select %176, %174, %177 : vector<4x256xi1>, vector<4x256xf32>
    %179 = tpu.concatenate %158, %159, %164, %165, %166, %171, %172, %173, %178 in 0 : vector<4x256xf32>, vector<4x256xf32>, vector<4x256xf32>, vector<4x256xf32>, vector<4x256xf32>, vector<4x256xf32>, vector<4x256xf32>, vector<4x256xf32>, vector<4x256xf32> -> vector<36x256xf32>
    %cst_42 = arith.constant dense<0.000000e+00> : vector<4x256xf32>
    %180 = tpu.matmul %73, %179, %cst_42 {dimension_numbers = #tpu.dot_dimension_numbers<[1], [0], [0], [1], [0, 0, 1, 1], [], []>} : vector<4x36xf32>, vector<36x256xf32>, vector<4x256xf32> -> vector<4x256xf32>
    %181 = vector.broadcast %74 : vector<4x1xf32> to vector<4x256xf32>
    %182 = arith.addf %180, %181 : vector<4x256xf32>
    %cst_43 = arith.constant 0.000000e+00 : f32
    %183 = vector.broadcast %cst_43 : f32 to vector<4x256xf32>
    %184 = arith.cmpf oge, %107, %183 : vector<4x256xf32>
    %cst_44 = arith.constant 2.000000e-01 : f32
    %185 = vector.broadcast %cst_44 : f32 to vector<4x256xf32>
    %186 = arith.mulf %185, %107 : vector<4x256xf32>
    %187 = arith.select %184, %107, %186 : vector<4x256xi1>, vector<4x256xf32>
    %cst_45 = arith.constant 0.000000e+00 : f32
    %188 = vector.broadcast %cst_45 : f32 to vector<4x256xf32>
    %189 = arith.cmpf oge, %132, %188 : vector<4x256xf32>
    %cst_46 = arith.constant 2.000000e-01 : f32
    %190 = vector.broadcast %cst_46 : f32 to vector<4x256xf32>
    %191 = arith.mulf %190, %132 : vector<4x256xf32>
    %192 = arith.select %189, %132, %191 : vector<4x256xi1>, vector<4x256xf32>
    %cst_47 = arith.constant 0.000000e+00 : f32
    %193 = vector.broadcast %cst_47 : f32 to vector<4x256xf32>
    %194 = arith.cmpf oge, %157, %193 : vector<4x256xf32>
    %cst_48 = arith.constant 2.000000e-01 : f32
    %195 = vector.broadcast %cst_48 : f32 to vector<4x256xf32>
    %196 = arith.mulf %195, %157 : vector<4x256xf32>
    %197 = arith.select %194, %157, %196 : vector<4x256xi1>, vector<4x256xf32>
    %cst_49 = arith.constant 0.000000e+00 : f32
    %198 = vector.broadcast %cst_49 : f32 to vector<4x256xf32>
    %199 = arith.cmpf oge, %182, %198 : vector<4x256xf32>
    %cst_50 = arith.constant 2.000000e-01 : f32
    %200 = vector.broadcast %cst_50 : f32 to vector<4x256xf32>
    %201 = arith.mulf %200, %182 : vector<4x256xf32>
    %202 = arith.select %199, %182, %201 : vector<4x256xi1>, vector<4x256xf32>
    %c0_51 = arith.constant 0 : index
    %c0_52 = arith.constant 0 : index
    %203 = vector.load %arg6[%c0_51, %c0_52] : memref<4x36xf32, #tpu.memory_space<vmem>>, vector<4x36xf32>
    %c0_53 = arith.constant 0 : index
    %c0_54 = arith.constant 0 : index
    %204 = vector.load %arg7[%c0_53, %c0_54] : memref<4x1xf32, #tpu.memory_space<vmem>>, vector<4x1xf32>
    %cst_55 = arith.constant 0.000000e+00 : f32
    %205 = vector.broadcast %cst_55 : f32 to vector<4x128xf32>
    %206 = tpu.concatenate %205, %187, %205 in 1 : vector<4x128xf32>, vector<4x256xf32>, vector<4x128xf32> -> vector<4x512xf32>
    %cst_56 = arith.constant 0.000000e+00 : f32
    %207 = vector.broadcast %cst_56 : f32 to vector<4x128xf32>
    %208 = tpu.concatenate %207, %192, %207 in 1 : vector<4x128xf32>, vector<4x256xf32>, vector<4x128xf32> -> vector<4x512xf32>
    %cst_57 = arith.constant 0.000000e+00 : f32
    %209 = vector.broadcast %cst_57 : f32 to vector<4x128xf32>
    %210 = tpu.concatenate %209, %197, %209 in 1 : vector<4x128xf32>, vector<4x256xf32>, vector<4x128xf32> -> vector<4x512xf32>
    %cst_58 = arith.constant 0.000000e+00 : f32
    %211 = vector.broadcast %cst_58 : f32 to vector<4x128xf32>
    %212 = tpu.concatenate %211, %202, %211 in 1 : vector<4x128xf32>, vector<4x256xf32>, vector<4x128xf32> -> vector<4x512xf32>
    %213 = vector.extract_strided_slice %212 {offsets = [0, 111], sizes = [4, 256], strides = [1, 1]} : vector<4x512xf32> to vector<4x256xf32>
    %cst_59 = arith.constant 0.000000e+00 : f32
    %214 = vector.shape_cast %18 : vector<1x256xi1> to vector<1x256xi1>
    %215 = vector.broadcast %214 : vector<1x256xi1> to vector<4x256xi1>
    %216 = vector.broadcast %cst_59 : f32 to vector<4x256xf32>
    %217 = arith.select %215, %213, %216 : vector<4x256xi1>, vector<4x256xf32>
    %218 = vector.extract_strided_slice %210 {offsets = [0, 112], sizes = [4, 256], strides = [1, 1]} : vector<4x512xf32> to vector<4x256xf32>
    %219 = vector.extract_strided_slice %212 {offsets = [0, 112], sizes = [4, 256], strides = [1, 1]} : vector<4x512xf32> to vector<4x256xf32>
    %220 = vector.extract_strided_slice %208 {offsets = [0, 127], sizes = [4, 256], strides = [1, 1]} : vector<4x512xf32> to vector<4x256xf32>
    %cst_60 = arith.constant 0.000000e+00 : f32
    %221 = vector.shape_cast %18 : vector<1x256xi1> to vector<1x256xi1>
    %222 = vector.broadcast %221 : vector<1x256xi1> to vector<4x256xi1>
    %223 = vector.broadcast %cst_60 : f32 to vector<4x256xf32>
    %224 = arith.select %222, %220, %223 : vector<4x256xi1>, vector<4x256xf32>
    %225 = vector.extract_strided_slice %206 {offsets = [0, 128], sizes = [4, 256], strides = [1, 1]} : vector<4x512xf32> to vector<4x256xf32>
    %226 = vector.extract_strided_slice %208 {offsets = [0, 128], sizes = [4, 256], strides = [1, 1]} : vector<4x512xf32> to vector<4x256xf32>
    %227 = vector.extract_strided_slice %212 {offsets = [0, 127], sizes = [4, 256], strides = [1, 1]} : vector<4x512xf32> to vector<4x256xf32>
    %cst_61 = arith.constant 0.000000e+00 : f32
    %228 = vector.shape_cast %18 : vector<1x256xi1> to vector<1x256xi1>
    %229 = vector.broadcast %228 : vector<1x256xi1> to vector<4x256xi1>
    %230 = vector.broadcast %cst_61 : f32 to vector<4x256xf32>
    %231 = arith.select %229, %227, %230 : vector<4x256xi1>, vector<4x256xf32>
    %232 = vector.extract_strided_slice %210 {offsets = [0, 128], sizes = [4, 256], strides = [1, 1]} : vector<4x512xf32> to vector<4x256xf32>
    %233 = vector.extract_strided_slice %212 {offsets = [0, 128], sizes = [4, 256], strides = [1, 1]} : vector<4x512xf32> to vector<4x256xf32>
    %234 = tpu.concatenate %217, %218, %219, %224, %225, %226, %231, %232, %233 in 0 : vector<4x256xf32>, vector<4x256xf32>, vector<4x256xf32>, vector<4x256xf32>, vector<4x256xf32>, vector<4x256xf32>, vector<4x256xf32>, vector<4x256xf32>, vector<4x256xf32> -> vector<36x256xf32>
    %cst_62 = arith.constant dense<0.000000e+00> : vector<4x256xf32>
    %235 = tpu.matmul %203, %234, %cst_62 {dimension_numbers = #tpu.dot_dimension_numbers<[1], [0], [0], [1], [0, 0, 1, 1], [], []>} : vector<4x36xf32>, vector<36x256xf32>, vector<4x256xf32> -> vector<4x256xf32>
    %236 = vector.broadcast %204 : vector<4x1xf32> to vector<4x256xf32>
    %237 = arith.addf %235, %236 : vector<4x256xf32>
    %238 = vector.extract_strided_slice %210 {offsets = [0, 112], sizes = [4, 256], strides = [1, 1]} : vector<4x512xf32> to vector<4x256xf32>
    %239 = vector.extract_strided_slice %212 {offsets = [0, 112], sizes = [4, 256], strides = [1, 1]} : vector<4x512xf32> to vector<4x256xf32>
    %240 = vector.extract_strided_slice %210 {offsets = [0, 113], sizes = [4, 256], strides = [1, 1]} : vector<4x512xf32> to vector<4x256xf32>
    %cst_63 = arith.constant 0.000000e+00 : f32
    %241 = vector.shape_cast %20 : vector<1x256xi1> to vector<1x256xi1>
    %242 = vector.broadcast %241 : vector<1x256xi1> to vector<4x256xi1>
    %243 = vector.broadcast %cst_63 : f32 to vector<4x256xf32>
    %244 = arith.select %242, %240, %243 : vector<4x256xi1>, vector<4x256xf32>
    %245 = vector.extract_strided_slice %206 {offsets = [0, 128], sizes = [4, 256], strides = [1, 1]} : vector<4x512xf32> to vector<4x256xf32>
    %246 = vector.extract_strided_slice %208 {offsets = [0, 128], sizes = [4, 256], strides = [1, 1]} : vector<4x512xf32> to vector<4x256xf32>
    %247 = vector.extract_strided_slice %206 {offsets = [0, 129], sizes = [4, 256], strides = [1, 1]} : vector<4x512xf32> to vector<4x256xf32>
    %cst_64 = arith.constant 0.000000e+00 : f32
    %248 = vector.shape_cast %20 : vector<1x256xi1> to vector<1x256xi1>
    %249 = vector.broadcast %248 : vector<1x256xi1> to vector<4x256xi1>
    %250 = vector.broadcast %cst_64 : f32 to vector<4x256xf32>
    %251 = arith.select %249, %247, %250 : vector<4x256xi1>, vector<4x256xf32>
    %252 = vector.extract_strided_slice %210 {offsets = [0, 128], sizes = [4, 256], strides = [1, 1]} : vector<4x512xf32> to vector<4x256xf32>
    %253 = vector.extract_strided_slice %212 {offsets = [0, 128], sizes = [4, 256], strides = [1, 1]} : vector<4x512xf32> to vector<4x256xf32>
    %254 = vector.extract_strided_slice %210 {offsets = [0, 129], sizes = [4, 256], strides = [1, 1]} : vector<4x512xf32> to vector<4x256xf32>
    %cst_65 = arith.constant 0.000000e+00 : f32
    %255 = vector.shape_cast %20 : vector<1x256xi1> to vector<1x256xi1>
    %256 = vector.broadcast %255 : vector<1x256xi1> to vector<4x256xi1>
    %257 = vector.broadcast %cst_65 : f32 to vector<4x256xf32>
    %258 = arith.select %256, %254, %257 : vector<4x256xi1>, vector<4x256xf32>
    %259 = tpu.concatenate %238, %239, %244, %245, %246, %251, %252, %253, %258 in 0 : vector<4x256xf32>, vector<4x256xf32>, vector<4x256xf32>, vector<4x256xf32>, vector<4x256xf32>, vector<4x256xf32>, vector<4x256xf32>, vector<4x256xf32>, vector<4x256xf32> -> vector<36x256xf32>
    %cst_66 = arith.constant dense<0.000000e+00> : vector<4x256xf32>
    %260 = tpu.matmul %203, %259, %cst_66 {dimension_numbers = #tpu.dot_dimension_numbers<[1], [0], [0], [1], [0, 0, 1, 1], [], []>} : vector<4x36xf32>, vector<36x256xf32>, vector<4x256xf32> -> vector<4x256xf32>
    %261 = vector.broadcast %204 : vector<4x1xf32> to vector<4x256xf32>
    %262 = arith.addf %260, %261 : vector<4x256xf32>
    %263 = vector.extract_strided_slice %208 {offsets = [0, 127], sizes = [4, 256], strides = [1, 1]} : vector<4x512xf32> to vector<4x256xf32>
    %cst_67 = arith.constant 0.000000e+00 : f32
    %264 = vector.shape_cast %18 : vector<1x256xi1> to vector<1x256xi1>
    %265 = vector.broadcast %264 : vector<1x256xi1> to vector<4x256xi1>
    %266 = vector.broadcast %cst_67 : f32 to vector<4x256xf32>
    %267 = arith.select %265, %263, %266 : vector<4x256xi1>, vector<4x256xf32>
    %268 = vector.extract_strided_slice %206 {offsets = [0, 128], sizes = [4, 256], strides = [1, 1]} : vector<4x512xf32> to vector<4x256xf32>
    %269 = vector.extract_strided_slice %208 {offsets = [0, 128], sizes = [4, 256], strides = [1, 1]} : vector<4x512xf32> to vector<4x256xf32>
    %270 = vector.extract_strided_slice %212 {offsets = [0, 127], sizes = [4, 256], strides = [1, 1]} : vector<4x512xf32> to vector<4x256xf32>
    %cst_68 = arith.constant 0.000000e+00 : f32
    %271 = vector.shape_cast %18 : vector<1x256xi1> to vector<1x256xi1>
    %272 = vector.broadcast %271 : vector<1x256xi1> to vector<4x256xi1>
    %273 = vector.broadcast %cst_68 : f32 to vector<4x256xf32>
    %274 = arith.select %272, %270, %273 : vector<4x256xi1>, vector<4x256xf32>
    %275 = vector.extract_strided_slice %210 {offsets = [0, 128], sizes = [4, 256], strides = [1, 1]} : vector<4x512xf32> to vector<4x256xf32>
    %276 = vector.extract_strided_slice %212 {offsets = [0, 128], sizes = [4, 256], strides = [1, 1]} : vector<4x512xf32> to vector<4x256xf32>
    %277 = vector.extract_strided_slice %208 {offsets = [0, 143], sizes = [4, 256], strides = [1, 1]} : vector<4x512xf32> to vector<4x256xf32>
    %cst_69 = arith.constant 0.000000e+00 : f32
    %278 = vector.shape_cast %18 : vector<1x256xi1> to vector<1x256xi1>
    %279 = vector.broadcast %278 : vector<1x256xi1> to vector<4x256xi1>
    %280 = vector.broadcast %cst_69 : f32 to vector<4x256xf32>
    %281 = arith.select %279, %277, %280 : vector<4x256xi1>, vector<4x256xf32>
    %282 = vector.extract_strided_slice %206 {offsets = [0, 144], sizes = [4, 256], strides = [1, 1]} : vector<4x512xf32> to vector<4x256xf32>
    %283 = vector.extract_strided_slice %208 {offsets = [0, 144], sizes = [4, 256], strides = [1, 1]} : vector<4x512xf32> to vector<4x256xf32>
    %284 = tpu.concatenate %267, %268, %269, %274, %275, %276, %281, %282, %283 in 0 : vector<4x256xf32>, vector<4x256xf32>, vector<4x256xf32>, vector<4x256xf32>, vector<4x256xf32>, vector<4x256xf32>, vector<4x256xf32>, vector<4x256xf32>, vector<4x256xf32> -> vector<36x256xf32>
    %cst_70 = arith.constant dense<0.000000e+00> : vector<4x256xf32>
    %285 = tpu.matmul %203, %284, %cst_70 {dimension_numbers = #tpu.dot_dimension_numbers<[1], [0], [0], [1], [0, 0, 1, 1], [], []>} : vector<4x36xf32>, vector<36x256xf32>, vector<4x256xf32> -> vector<4x256xf32>
    %286 = vector.broadcast %204 : vector<4x1xf32> to vector<4x256xf32>
    %287 = arith.addf %285, %286 : vector<4x256xf32>
    %288 = vector.extract_strided_slice %206 {offsets = [0, 128], sizes = [4, 256], strides = [1, 1]} : vector<4x512xf32> to vector<4x256xf32>
    %289 = vector.extract_strided_slice %208 {offsets = [0, 128], sizes = [4, 256], strides = [1, 1]} : vector<4x512xf32> to vector<4x256xf32>
    %290 = vector.extract_strided_slice %206 {offsets = [0, 129], sizes = [4, 256], strides = [1, 1]} : vector<4x512xf32> to vector<4x256xf32>
    %cst_71 = arith.constant 0.000000e+00 : f32
    %291 = vector.shape_cast %20 : vector<1x256xi1> to vector<1x256xi1>
    %292 = vector.broadcast %291 : vector<1x256xi1> to vector<4x256xi1>
    %293 = vector.broadcast %cst_71 : f32 to vector<4x256xf32>
    %294 = arith.select %292, %290, %293 : vector<4x256xi1>, vector<4x256xf32>
    %295 = vector.extract_strided_slice %210 {offsets = [0, 128], sizes = [4, 256], strides = [1, 1]} : vector<4x512xf32> to vector<4x256xf32>
    %296 = vector.extract_strided_slice %212 {offsets = [0, 128], sizes = [4, 256], strides = [1, 1]} : vector<4x512xf32> to vector<4x256xf32>
    %297 = vector.extract_strided_slice %210 {offsets = [0, 129], sizes = [4, 256], strides = [1, 1]} : vector<4x512xf32> to vector<4x256xf32>
    %cst_72 = arith.constant 0.000000e+00 : f32
    %298 = vector.shape_cast %20 : vector<1x256xi1> to vector<1x256xi1>
    %299 = vector.broadcast %298 : vector<1x256xi1> to vector<4x256xi1>
    %300 = vector.broadcast %cst_72 : f32 to vector<4x256xf32>
    %301 = arith.select %299, %297, %300 : vector<4x256xi1>, vector<4x256xf32>
    %302 = vector.extract_strided_slice %206 {offsets = [0, 144], sizes = [4, 256], strides = [1, 1]} : vector<4x512xf32> to vector<4x256xf32>
    %303 = vector.extract_strided_slice %208 {offsets = [0, 144], sizes = [4, 256], strides = [1, 1]} : vector<4x512xf32> to vector<4x256xf32>
    %304 = vector.extract_strided_slice %206 {offsets = [0, 145], sizes = [4, 256], strides = [1, 1]} : vector<4x512xf32> to vector<4x256xf32>
    %cst_73 = arith.constant 0.000000e+00 : f32
    %305 = vector.shape_cast %20 : vector<1x256xi1> to vector<1x256xi1>
    %306 = vector.broadcast %305 : vector<1x256xi1> to vector<4x256xi1>
    %307 = vector.broadcast %cst_73 : f32 to vector<4x256xf32>
    %308 = arith.select %306, %304, %307 : vector<4x256xi1>, vector<4x256xf32>
    %309 = tpu.concatenate %288, %289, %294, %295, %296, %301, %302, %303, %308 in 0 : vector<4x256xf32>, vector<4x256xf32>, vector<4x256xf32>, vector<4x256xf32>, vector<4x256xf32>, vector<4x256xf32>, vector<4x256xf32>, vector<4x256xf32>, vector<4x256xf32> -> vector<36x256xf32>
    %cst_74 = arith.constant dense<0.000000e+00> : vector<4x256xf32>
    %310 = tpu.matmul %203, %309, %cst_74 {dimension_numbers = #tpu.dot_dimension_numbers<[1], [0], [0], [1], [0, 0, 1, 1], [], []>} : vector<4x36xf32>, vector<36x256xf32>, vector<4x256xf32> -> vector<4x256xf32>
    %311 = vector.broadcast %204 : vector<4x1xf32> to vector<4x256xf32>
    %312 = arith.addf %310, %311 : vector<4x256xf32>
    %313 = arith.addf %69, %237 : vector<4x256xf32>
    %cst_75 = arith.constant 0.000000e+00 : f32
    %314 = vector.broadcast %cst_75 : f32 to vector<4x256xf32>
    %315 = arith.cmpf oge, %313, %314 : vector<4x256xf32>
    %cst_76 = arith.constant 2.000000e-01 : f32
    %316 = vector.broadcast %cst_76 : f32 to vector<4x256xf32>
    %317 = arith.mulf %316, %313 : vector<4x256xf32>
    %318 = arith.select %315, %313, %317 : vector<4x256xi1>, vector<4x256xf32>
    %c0_77 = arith.constant 0 : index
    %c0_78 = arith.constant 0 : index
    %c0_79 = arith.constant 0 : index
    %c0_80 = arith.constant 0 : index
    %319 = vector.load %arg8[%c0_77, %c0_78, %c0_79, %c0_80] : memref<1x4x4x256xf32, #tpu.memory_space<vmem>>, vector<1x1x4x256xf32>
    %320 = vector.shape_cast %319 : vector<1x1x4x256xf32> to vector<4x256xf32>
    %321 = vector.shape_cast %318 : vector<4x256xf32> to vector<1x1x4x256xf32>
    tpu.vector_store %arg8[%c0_77, %c0_78, %c0_79, %c0_80], %321 {strides = array<i32>} : memref<1x4x4x256xf32, #tpu.memory_space<vmem>>, vector<1x1x4x256xf32>,
    %322 = arith.addf %70, %262 : vector<4x256xf32>
    %cst_81 = arith.constant 0.000000e+00 : f32
    %323 = vector.broadcast %cst_81 : f32 to vector<4x256xf32>
    %324 = arith.cmpf oge, %322, %323 : vector<4x256xf32>
    %cst_82 = arith.constant 2.000000e-01 : f32
    %325 = vector.broadcast %cst_82 : f32 to vector<4x256xf32>
    %326 = arith.mulf %325, %322 : vector<4x256xf32>
    %327 = arith.select %324, %322, %326 : vector<4x256xi1>, vector<4x256xf32>
    %c0_83 = arith.constant 0 : index
    %c1 = arith.constant 1 : index
    %c0_84 = arith.constant 0 : index
    %c0_85 = arith.constant 0 : index
    %328 = vector.load %arg8[%c0_83, %c1, %c0_84, %c0_85] : memref<1x4x4x256xf32, #tpu.memory_space<vmem>>, vector<1x1x4x256xf32>
    %329 = vector.shape_cast %328 : vector<1x1x4x256xf32> to vector<4x256xf32>
    %330 = vector.shape_cast %327 : vector<4x256xf32> to vector<1x1x4x256xf32>
    tpu.vector_store %arg8[%c0_83, %c1, %c0_84, %c0_85], %330 {strides = array<i32>} : memref<1x4x4x256xf32, #tpu.memory_space<vmem>>, vector<1x1x4x256xf32>,
    %331 = arith.addf %71, %287 : vector<4x256xf32>
    %cst_86 = arith.constant 0.000000e+00 : f32
    %332 = vector.broadcast %cst_86 : f32 to vector<4x256xf32>
    %333 = arith.cmpf oge, %331, %332 : vector<4x256xf32>
    %cst_87 = arith.constant 2.000000e-01 : f32
    %334 = vector.broadcast %cst_87 : f32 to vector<4x256xf32>
    %335 = arith.mulf %334, %331 : vector<4x256xf32>
    %336 = arith.select %333, %331, %335 : vector<4x256xi1>, vector<4x256xf32>
    %c0_88 = arith.constant 0 : index
    %c2 = arith.constant 2 : index
    %c0_89 = arith.constant 0 : index
    %c0_90 = arith.constant 0 : index
    %337 = vector.load %arg8[%c0_88, %c2, %c0_89, %c0_90] : memref<1x4x4x256xf32, #tpu.memory_space<vmem>>, vector<1x1x4x256xf32>
    %338 = vector.shape_cast %337 : vector<1x1x4x256xf32> to vector<4x256xf32>
    %339 = vector.shape_cast %336 : vector<4x256xf32> to vector<1x1x4x256xf32>
    tpu.vector_store %arg8[%c0_88, %c2, %c0_89, %c0_90], %339 {strides = array<i32>} : memref<1x4x4x256xf32, #tpu.memory_space<vmem>>, vector<1x1x4x256xf32>,
    %340 = arith.addf %72, %312 : vector<4x256xf32>
    %cst_91 = arith.constant 0.000000e+00 : f32
    %341 = vector.broadcast %cst_91 : f32 to vector<4x256xf32>
    %342 = arith.cmpf oge, %340, %341 : vector<4x256xf32>
    %cst_92 = arith.constant 2.000000e-01 : f32
    %343 = vector.broadcast %cst_92 : f32 to vector<4x256xf32>
    %344 = arith.mulf %343, %340 : vector<4x256xf32>
    %345 = arith.select %342, %340, %344 : vector<4x256xi1>, vector<4x256xf32>
    %c0_93 = arith.constant 0 : index
    %c3 = arith.constant 3 : index
    %c0_94 = arith.constant 0 : index
    %c0_95 = arith.constant 0 : index
    %346 = vector.load %arg8[%c0_93, %c3, %c0_94, %c0_95] : memref<1x4x4x256xf32, #tpu.memory_space<vmem>>, vector<1x1x4x256xf32>
    %347 = vector.shape_cast %346 : vector<1x1x4x256xf32> to vector<4x256xf32>
    %348 = vector.shape_cast %345 : vector<4x256xf32> to vector<1x1x4x256xf32>
    tpu.vector_store %arg8[%c0_93, %c3, %c0_94, %c0_95], %348 {strides = array<i32>} : memref<1x4x4x256xf32, #tpu.memory_space<vmem>>, vector<1x1x4x256xf32>,
    return
  }
  func.func @transform_0(%arg0: i32) -> (i32, i32, i32) {
    %c0_i32 = arith.constant 0 : i32
    %c0_i32_0 = arith.constant 0 : i32
    %c0_i32_1 = arith.constant 0 : i32
    return %arg0, %c0_i32, %c0_i32_0 : i32, i32, i32
  }
  func.func @transform_1(%arg0: i32) -> (i32, i32) {
    %c0_i32 = arith.constant 0 : i32
    %c0_i32_0 = arith.constant 0 : i32
    %c0_i32_1 = arith.constant 0 : i32
    return %c0_i32, %c0_i32_0 : i32, i32
  }
  func.func @transform_2(%arg0: i32) -> (i32, i32) {
    %c0_i32 = arith.constant 0 : i32
    %c0_i32_0 = arith.constant 0 : i32
    %c0_i32_1 = arith.constant 0 : i32
    return %c0_i32, %c0_i32_0 : i32, i32
  }
  func.func @transform_3(%arg0: i32) -> (i32, i32) {
    %c0_i32 = arith.constant 0 : i32
    %c0_i32_0 = arith.constant 0 : i32
    %c0_i32_1 = arith.constant 0 : i32
    return %c0_i32, %c0_i32_0 : i32, i32
  }
  func.func @transform_4(%arg0: i32) -> (i32, i32) {
    %c0_i32 = arith.constant 0 : i32
    %c0_i32_0 = arith.constant 0 : i32
    %c0_i32_1 = arith.constant 0 : i32
    return %c0_i32, %c0_i32_0 : i32, i32
  }
  func.func @transform_5(%arg0: i32) -> (i32, i32) {
    %c0_i32 = arith.constant 0 : i32
    %c0_i32_0 = arith.constant 0 : i32
    %c0_i32_1 = arith.constant 0 : i32
    return %c0_i32, %c0_i32_0 : i32, i32
  }
  func.func @transform_6(%arg0: i32) -> (i32, i32) {
    %c0_i32 = arith.constant 0 : i32
    %c0_i32_0 = arith.constant 0 : i32
    %c0_i32_1 = arith.constant 0 : i32
    return %c0_i32, %c0_i32_0 : i32, i32
  }
  func.func @transform_7(%arg0: i32) -> (i32, i32, i32, i32) {
    %c0_i32 = arith.constant 0 : i32
    %c0_i32_0 = arith.constant 0 : i32
    %c0_i32_1 = arith.constant 0 : i32
    %c0_i32_2 = arith.constant 0 : i32
    return %arg0, %c0_i32, %c0_i32_0, %c0_i32_1 : i32, i32, i32, i32
  }
}

</mosaic_0001>

<bundles_post_ra>
// kernel: decoder_block_forward.1
= control target key start
LH: loop header
LB: loop body
LE: loop exit
PB: predicated region body
PF: predicated region fallthrough
CT: control target
= control target key end

     0   :  { %s2357_s24 = smov 0   ;;  %s3165_s0 = inlined_call_operand.vmem [shape: f32[2,4,256], index: 0, kind: input, shape index: {}]   ;;  %s3166_s1 = inlined_call_operand.vmem [shape: f32[16,36], index: 1, kind: input, shape index: {}]   ;;  %s3167_s2 = inlined_call_operand.vmem [shape: f32[16,1], index: 2, kind: input, shape index: {}]   ;;  %s3168_s3 = inlined_call_operand.vmem [shape: f32[4,36], index: 3, kind: input, shape index: {}]   ;;  %s3169_s4 = inlined_call_operand.vmem [shape: f32[4,1], index: 4, kind: input, shape index: {}]   ;;  %s3170_s5 = inlined_call_operand.vmem [shape: f32[4,36], index: 5, kind: input, shape index: {}]   ;;  %s3171_s6 = inlined_call_operand.vmem [shape: f32[4,1], index: 6, kind: input, shape index: {}]   ;;  %s3172_s7 = inlined_call_operand.vmem [shape: f32[2,4,4,256], index: 7, kind: output, shape index: {}]  }
   0x1 LB: > { %s1932_s25 = sadd.s32 4294967295, %s2305_s24   ;;  %p1936_p0 = scmp.ge.s32.totalorder %s2305_s24, 1  ;;  %s2305_s24 = sphi %s2357_s24, %s17_s24  }
   0x2   : > { %p237_p1 = scmp.lt.s32.totalorder %s2305_s24, 3 }
   0x4   : > { %p238_p2 = pnand %p1936_p0, %p237_p1 }
   0x5   : > { %v2307_v0 = vmov (!%p238_p2), 0.0   ;;  %s2308_s26 = smov (!%p238_p2), 1   ;;  %s2309_s27 = smov (!%p238_p2), 15   ;;  %v2316_v9 = vmov (!%p238_p2), 0   ;;  %v449_v10 = vld [vmem:[%s3167_s2] sm:$0xff] (!%p238_p2)  ;;  %v450_v11 = vld [vmem:[%s3167_s2 + $0x8] sm:$0xff] (!%p238_p2)  ;;  %v279_v12 = vlaneseq (!%p238_p2) }
   0x6   : > { %241 = sbr.rel (%p238_p2) target bundleno = 1486 (0x5ce), region = 48  ;;  %349 = vrot.lane.b32.xlu0 (!%p238_p2), %v2307_v0, %s2308_s26  ;;  %336 = vrot.lane.b32.xlu1 (!%p238_p2), %v2307_v0, %s2309_s27  ;;  %p269_p3 = scmp.lt.s32.totalorder (!%p238_p2), %s1932_s25, 1  ;;  %v2396_v7 = vrot.slane (!%p238_p2), %v2307_v0, 4  ;;  %vm355_vm0 = vcmask (!%p238_p2), 7168   ;;  %vm325_vm2 = vcmask (!%p238_p2), 138240   ;;  %vm410_vm4 = vcmask (!%p238_p2), 130048  }
   0x7   : > { %538 = vmatprep.mubr.f32.mxu0 (!%p238_p2), %v2307_v0  ;;  %713 = vmatprep.mubr.f32.mxu1 (!%p238_p2), %v2307_v0  ;;  %s2310_s28 = smov (!%p238_p2), 17   ;;  %s2311_s10 = smov (!%p238_p2), 16   ;;  %v280_v13 = vand.u32 (!%p238_p2), 127, %v279_v12  ;;  %vm342_vm5 = vcmask (!%p238_p2), 121856   ;;  %vm438_vm6 = vcmask (!%p238_p2), 1043456   ;;  %vm368_vm9 = vcmask (!%p238_p2), 1039360  }
   0x8   : > { %s2312_s11 = smov (!%p238_p2), 127   ;;  %s2313_s12 = smov (!%p238_p2), 113   ;;  %2102 = vset.pattern.permute.xlu0 (!%p238_p2), %v2316_v9  ;;  %2101 = vset.pattern.permute.xlu1 (!%p238_p2), %v2316_v9  ;;  %vm3174_vm10 = vcmask (!%p238_p2), 924672   ;;  %vm433_vm11 = vcmask (!%p238_p2), 916480   ;;  %vm3173_vm12 = vcmask (!%p238_p2), 908288   ;;  %vm461_vm13 = vcmask (!%p238_p2), 293888  }
   0x9   : > { %s2314_s13 = smov (!%p238_p2), 112   ;;  %s2315_s14 = smov (!%p238_p2), 111   ;;  %v281_v15 = vadd.s32 (!%p238_p2), 128, %v280_v13  ;;  %v286_v19 = vand.u32 (!%p238_p2), 15, %v280_v13 }
   0xa   : > { %319 = vrot.lane.b32.xlu0 (!%p238_p2), %v2307_v0, %s2310_s28 }
   0xb   : > { %v293_v18 = vand.u32 (!%p238_p2), 15, %v281_v15  ;;  %vm2432_vm3 = vcmp.ge.s32.totalorder (!%p238_p2), %v286_v19, 1  ;;  %vm2439_vm7 = vcmp.le.s32.totalorder (!%p238_p2), %v286_v19, 14 }
   0xd   : > { %s3192_s25 = smov (!%p269_p3, %s1932_s25), 1  ;;  %vm2428_vm1 = vcmp.ge.s32.totalorder %v293_v18, 1  ;;  %vm2444_vm8 = vcmp.le.s32.totalorder %v293_v18, 14 }
   0xe   : > { %s1974_s29 = sshll.u32 %s3192_s25, 3 }
   0xf   : > { %s273_s9 = scalar_lea.vmem %s3165_s0, %s1974_s29 }
  0x10   : > { %v2379_v1 = vld [vmem:[%s273_s9] sm:$0xff] }
  0x11   : > { %v2383_v2 = vcombine.high %v2379_v1, %v2379_v1  ;;  %v402_v3 = vrot.slane %v2379_v1, 4 }
  0x13   : > { %v2071_v4 = vpack.i.bf16 %v2383_v2, %v2379_v1  ;;  %v2081_v5 = vpack.i.bf16 %v2383_v2, %v402_v3  ;;  %v2086_v6 = vpack.i.bf16 %v2307_v0, %v2383_v2  ;;  %v2096_v8 = vpack.i.bf16 %v2396_v7, %v2383_v2 }
  0x15   : > { %2072 = vrot.lane.b32.xlu1 %v2071_v4, %s2310_s28  ;;  %2067 = vrot.lane.b32.xlu0 %v2071_v4, %s2308_s26 }
  0x19   : > { %2077 = vrot.lane.b32.xlu1 %v2071_v4, %s2309_s27  ;;  %2082 = vrot.lane.b32.xlu0 %v2081_v5, %s2311_s10 }
  0x1d   : > { %2087 = vrot.lane.b32.xlu1 %v2086_v6, %s2312_s11  ;;  %404 = vrot.lane.b32.xlu0 %v2396_v7, %s2311_s10 }
  0x21   : > { %362 = vrot.lane.b32.xlu1 %v2379_v1, %s2312_s11  ;;  %2092 = vrot.lane.b32.xlu0 %v2086_v6, %s2313_s12 }
  0x25   : > { %375 = vrot.lane.b32.xlu1 %v2379_v1, %s2313_s12  ;;  %2097 = vrot.lane.b32.xlu0 %v2096_v8, %s2314_s13 }
  0x29   : > { %427 = vrot.lane.b32.xlu1 %v402_v3, %s2314_s13  ;;  %390 = vrot.lane.b32.xlu0 %v2383_v2, %s2315_s14 }
  0x2d   : > { %392 = vrot.lane.b32.xlu1 %v2307_v0, %s2315_s14  ;;  %388 = vrot.lane.b32.xlu0 %v2379_v1, %s2315_s14 }
  0x31   : > { %453 = vperm.xlu0 %2102, %v449_v10   ;;  %458 = vperm.xlu1 %2101, %v450_v11  }
  0x78   : > { %v2422_v14 = vpop.permute.xlu0 %349  ;;  %v2424_v16 = vpop.permute.xlu1 %336 }
  0x7c   : > { %v2426_v17 = vpop.permute.xlu0 %319 }
  0x87   : > { %v2073_v20 = vpop.permute.xlu1 %2072  ;;  %v2068_v21 = vpop.permute.xlu0 %2067 }
  0x88   : > { %v2075_v24 = vunpack.i.h.bf16 %v2073_v20  ;;  %v2074_v25 = vunpack.i.l.bf16 %v2073_v20  ;;  %v2070_v26 = vunpack.i.h.bf16 %v2068_v21  ;;  %v2069_v27 = vunpack.i.l.bf16 %v2068_v21 }
  0x8a   : > { %v356_v28 = vsel %vm355_vm0, %v2422_v14, %v2069_v27  ;;  %v357_v29 = vsel %vm355_vm0, %v2069_v27, %v2070_v26  ;;  %v327_v31 = vsel %vm325_vm2, %v2074_v25, %v2075_v24  ;;  %v326_v36 = vsel %vm325_vm2, %v2426_v17, %v2074_v25 }
  0x8b   : > { %v2078_v32 = vpop.permute.xlu1 %2077  ;;  %v2083_v33 = vpop.permute.xlu0 %2082  ;;  %v361_v35 = vsel %vm2428_vm1, %v357_v29, 0.0  ;;  %v360_v37 = vsel %vm2432_vm3, %v356_v28, 0.0  ;;  %v331_v42 = vsel %vm2428_vm1, %v327_v31, 0.0  ;;  %v330_v46 = vsel %vm2432_vm3, %v326_v36, 0.0 }
  0x8c   : > { %v2080_v38 = vunpack.i.h.bf16 %v2078_v32  ;;  %v2079_v39 = vunpack.i.l.bf16 %v2078_v32  ;;  %v2085_v40 = vunpack.i.h.bf16 %v2083_v33  ;;  %v2084_v41 = vunpack.i.l.bf16 %v2083_v33 }
  0x8d   : > { %v418_v43 = vrot.slane %v361_v35, 4  ;;  %v417_v53 = vrot.slane %v360_v37, 4 }
  0x8e   : > { %v344_v44 = vsel %vm342_vm5, %v2079_v39, %v2080_v38  ;;  %v412_v45 = vsel %vm410_vm4, %v2084_v41, %v2085_v40  ;;  %v343_v47 = vsel %vm342_vm5, %v2424_v16, %v2079_v39 }
  0x8f   : > { %v2088_v48 = vpop.permute.xlu1 %2087  ;;  %v2462_v49 = vpop.permute.xlu0 %404  ;;  %v348_v50 = vsel %vm2444_vm8, %v344_v44, 0.0  ;;  %v440_v51 = vsel %vm438_vm6, %v331_v42, %v412_v45  ;;  %v347_v52 = vsel %vm2439_vm7, %v343_v47, 0.0  ;;  %v448_v42 = vld [vmem:[%s3166_s1 + $0x8] sm:$0xff] }
  0x90   : > { %v2469_v54 = vunpack.i.h.bf16 %v2088_v48  ;;  %v2089_v55 = vunpack.i.l.bf16 %v2088_v48  ;;  %v411_v56 = vsel %vm410_vm4, %v2462_v49, %v2084_v41  ;;  %v442_v57 = vsel %vm438_vm6, %v348_v50, %v418_v43 }
  0x91   : > { %v1976_v58 = vpack.c.bf16 %v442_v57, %v440_v51  ;;  %v439_v59 = vsel %vm438_vm6, %v330_v46, %v411_v56  ;;  %v441_v60 = vsel %vm438_vm6, %v347_v52, %v417_v53 }
  0x92   : > { %v370_v61 = vsel %vm368_vm9, %v2089_v55, %v2469_v54  ;;  %v1978_v62 = vpack.c.bf16 %v441_v60, %v439_v59 }
  0x93   : > { %v363_v63 = vpop.permute.xlu1 %362  ;;  %v2093_v3 = vpop.permute.xlu0 %2092  ;;  %1977 = vmatprep.subr.bf16.mxu0 %v1976_v58  ;;  %v374_v4 = vsel %vm2444_vm8, %v370_v61, 0.0 }
  0x94   : > { %v369_v5 = vsel %vm368_vm9, %v363_v63, %v2089_v55  ;;  %v2481_v6 = vunpack.i.h.bf16 %v2093_v3  ;;  %v2094_v8 = vunpack.i.l.bf16 %v2093_v3  ;;  %1979 = vmatpush1.bf16.msra.mxu0 %v1978_v62  ;;  %v424_v10 = vrot.slane %v374_v4, 4 }
  0x95   : > { %v373_v9 = vsel %vm2439_vm7, %v369_v5, 0.0 }
  0x96   : > { %v383_v11 = vsel %vm3174_vm10, %v2094_v8, %v2481_v6  ;;  %v423_v19 = vrot.slane %v373_v9, 4  ;;  %v444_v27 = vsel %vm438_vm6, %v2383_v2, %v424_v10 }
  0x97   : > { %v376_v12 = vpop.permute.xlu1 %375  ;;  %v2098_v13 = vpop.permute.xlu0 %2097  ;;  %v387_v24 = vsel %vm2428_vm1, %v383_v11, 0.0 }
  0x98   : > { %v2487_v15 = vunpack.i.h.bf16 %v2098_v13  ;;  %v2099_v18 = vunpack.i.l.bf16 %v2098_v13  ;;  %v382_v20 = vsel %vm3174_vm10, %v376_v12, %v2094_v8  ;;  %v443_v35 = vsel %vm438_vm6, %v2379_v1, %v423_v19  ;;  %v447_v1 = vld [vmem:[%s3166_s1] sm:$0xff] }
  0x99   : > { %v386_v29 = vsel %vm2432_vm3, %v382_v20, 0.0 }
  0x9a   : > { %v435_v21 = vsel %vm433_vm11, %v2099_v18, %v2487_v15 }
  0x9b   : > { %v428_v25 = vpop.permute.xlu1 %427  ;;  %v391_v26 = vpop.permute.xlu0 %390  ;;  %v446_v28 = vsel %vm438_vm6, %v387_v24, %v435_v21 }
  0x9c   : > { %v434_v31 = vsel %vm433_vm11, %v428_v25, %v2099_v18  ;;  %v1980_v32 = vpack.c.bf16 %v446_v28, %v444_v27 }
  0x9d   : > { %v445_v33 = vsel %vm438_vm6, %v386_v29, %v434_v31 }
  0x9e   : > { %1981 = vmatprep.subr.bf16.mxu0 %v1980_v32  ;;  %v1982_v36 = vpack.c.bf16 %v445_v33, %v443_v35 }
  0x9f   : > { %v2503_v37 = vpop.permute.xlu1 %392  ;;  %v389_v38 = vpop.permute.xlu0 %388 }
  0xa0   : > { %v396_v2 = vsel %vm3173_vm12, %v391_v26, %v2503_v37  ;;  %v395_v39 = vsel %vm3173_vm12, %v389_v38, %v391_v26  ;;  %1983 = vmatpush1.bf16.msra.mxu0 %v1982_v36 }
  0xa1   : > { %v400_v40 = vsel %vm2444_vm8, %v396_v2, 0.0  ;;  %v399_v41 = vsel %vm2439_vm7, %v395_v39, 0.0 }
  0xa2   : > { %1941 = vmatprep.subr.msk.mxu0 %vm438_vm6, %v400_v40 }
  0xa4   : > { %1942 = vmatpush1.msk.msra.mxu0 %vm438_vm6, %v399_v41 }
  0xa5   : > { %1943 = vmatmul.mubr.msk.f32.vlgmr.msra.gmra.mrb[0].mxu0 %vm461_vm13, %v447_v1 }
  0xa6   : > { %544 = vmatprep.mubr.f32.mxu0 %v2307_v0 }
  0xa9   : > { %1944 = vmatmul.mubr.msk.f32.gmra.mrb[2].mxu0 %vm461_vm13, %v448_v42 }
  0xaa   : > { %948 = vmatprep.mubr.f32.mxu0 %v2307_v0 }
  0xb0   : > { %v454_v43 = vpop.permute.xlu0 %453  ;;  %v459_v48 = vpop.permute.xlu1 %458 }
 0x178   : > { %v540_v44 = vpop.f32.mrb[0].mxu0 }
 0x179   : > { %v541_v45 = vadd.f32 %v540_v44, %v454_v43  ;;  %v542_v46 = vpop.f32.mrb[1].mxu0 }
 0x17a   : > { %v543_v47 = vadd.f32 %v542_v46, %v454_v43 }
 0x17b   : > { %vm551_vm14 = vcmp.ge.f32.partialorder %v541_v45, 0.0  ;;  %v555_v50 = vmul.f32 0.1, %v541_v45 }
 0x17c   : > { %vm552_vm15 = vcmp.ge.f32.partialorder %v543_v47, 0.0  ;;  %v556_v51 = vmul.f32 0.1, %v543_v47  ;;  %v546_v52 = vpop.f32.mrb[2].mxu0 }
 0x17d   : > { %v2524_v53 = vsel %vm551_vm14, %v541_v45, %v555_v50  ;;  %v547_v55 = vadd.f32 %v546_v52, %v459_v48  ;;  %v548_v56 = vpop.f32.mrb[3].mxu0  ;;  %vm3185_vm14 = vcmask 908288  }
 0x17e   : > { %v2526_v57 = vsel %vm552_vm15, %v543_v47, %v556_v51  ;;  %v549_v58 = vadd.f32 %v548_v56, %v459_v48  ;;  %v2529_v60 = vrot.slane %v2524_v53, 4  ;;  %vm3186_vm15 = vmmov %vm3185_vm14 }
 0x17f   : > { %vm553_vm12 = vcmp.ge.f32.partialorder %v547_v55, 0.0  ;;  %v557_v59 = vmul.f32 0.1, %v547_v55  ;;  %v2532_v61 = vrot.slane %v2526_v57, 4  ;;  %v2108_v8 = vpack.i.bf16 %v2526_v57, %v2524_v53 }
 0x180   : > { %vm554_vm10 = vcmp.ge.f32.partialorder %v549_v58, 0.0  ;;  %v558_v62 = vmul.f32 0.1, %v549_v58  ;;  %v625_v35 = vrot.slane %v2529_v60, 4 }
 0x181   : > { %v2534_v63 = vsel %vm553_vm12, %v547_v55, %v557_v59  ;;  %v2113_v5 = vpack.i.bf16 %v2532_v61, %v2529_v60  ;;  %v626_v33 = vrot.slane %v2532_v61, 4  ;;  %v2153_v59 = vpack.i.bf16 %v2529_v60, %v2532_v61 }
 0x182   : > { %v2536_v3 = vsel %vm554_vm10, %v549_v58, %v558_v62  ;;  %740 = vrot.lane.b32.xlu0 %v2534_v63, %s2312_s11  ;;  %v2549_v9 = vrot.slane %v2534_v63, 4  ;;  %v2597_v44 = vsel %vm438_vm6, %v2524_v53, %v625_v35  ;;  %vm3183_vm10 = vcmask 924672  }
 0x183   : > { %v2103_v4 = vpack.i.bf16 %v2536_v3, %v2534_v63  ;;  %v2552_v10 = vrot.slane %v2536_v3, 4  ;;  %v2591_v43 = vsel %vm438_vm6, %v2526_v57, %v626_v33  ;;  %vm3184_vm12 = vmmov %vm3183_vm10 }
 0x184   : > { %v750_v46 = vrot.slane %v2549_v9, 4 }
 0x185   : > { %2104 = vrot.lane.b32.xlu1 %v2103_v4, %s2309_s27  ;;  %v2123_v11 = vpack.i.bf16 %v2552_v10, %v2549_v9  ;;  %v751_v47 = vrot.slane %v2552_v10, 4 }
 0x186   : > { %2114 = vrot.lane.b32.xlu0 %v2113_v5, %s2308_s26 }
 0x189   : > { %2109 = vrot.lane.b32.xlu1 %v2108_v8, %s2312_s11 }
 0x18a   : > { %765 = vrot.lane.b32.xlu0 %v2529_v60, %s2314_s13 }
 0x18d   : > { %742 = vrot.lane.b32.xlu1 %v2536_v3, %s2312_s11 }
 0x18e   : > { %2124 = vrot.lane.b32.xlu0 %v2123_v11, %s2311_s10 }
 0x191   : > { %615 = vrot.lane.b32.xlu1 %v2307_v0, %s2311_s10 }
 0x192   : > { %2129 = vrot.lane.b32.xlu0 %v2123_v11, %s2308_s26 }
 0x195   : > { %767 = vrot.lane.b32.xlu1 %v2532_v61, %s2314_s13 }
 0x199   : > { %2119 = vrot.lane.b32.xlu1 %v2123_v11, %s2310_s28  ;;  %v2148_v11 = vpack.i.bf16 %v751_v47, %v750_v46 }
 0x1f4   : > { %v741_v12 = vpop.permute.xlu0 %740 }
 0x1f7   : > { %v2105_v13 = vpop.permute.xlu1 %2104 }
 0x1f8   : > { %v2107_v18 = vunpack.i.h.bf16 %v2105_v13  ;;  %v2106_v19 = vunpack.i.l.bf16 %v2105_v13  ;;  %v2115_v20 = vpop.permute.xlu0 %2114 }
 0x1f9   : > { %v2117_v50 = vunpack.i.h.bf16 %v2115_v20  ;;  %v2116_v51 = vunpack.i.l.bf16 %v2115_v20  ;;  %v2629_v20 = vsel %vm438_vm6, %v2534_v63, %v750_v46 }
 0x1fa   : > { %v724_v21 = vsel %vm342_vm5, %v2424_v16, %v2106_v19  ;;  %v725_v24 = vsel %vm342_vm5, %v2106_v19, %v2107_v18 }
 0x1fb   : > { %v2110_v25 = vpop.permute.xlu1 %2109  ;;  %v728_v26 = vsel %vm2439_vm7, %v724_v21, 0.0  ;;  %v729_v27 = vsel %vm2444_vm8, %v725_v24, 0.0  ;;  %v591_v13 = vsel %vm355_vm0, %v2422_v14, %v2116_v51  ;;  %v592_v18 = vsel %vm355_vm0, %v2116_v51, %v2117_v50 }
 0x1fc   : > { %v2112_v28 = vunpack.i.h.bf16 %v2110_v25  ;;  %v2111_v29 = vunpack.i.l.bf16 %v2110_v25  ;;  %v2575_v31 = vpop.permute.xlu0 %765  ;;  %v2138_v32 = vpack.i.bf16 %v729_v27, %v728_v26  ;;  %v2635_v26 = vsel %vm438_vm6, %v2536_v3, %v751_v47 }
 0x1fe   : > { %v735_v36 = vsel %vm368_vm9, %v2112_v28, %v2469_v54  ;;  %v734_v38 = vsel %vm368_vm9, %v2111_v29, %v2112_v28  ;;  %2139 = vrot.lane.b32.xlu1 %v2138_v32, %s2314_s13  ;;  %v595_v28 = vsel %vm2432_vm3, %v591_v13, 0.0 }
 0x1ff   : > { %v743_v2 = vpop.permute.xlu1 %742  ;;  %v738_v39 = vsel %vm2439_vm7, %v734_v38, 0.0  ;;  %v739_v40 = vsel %vm2444_vm8, %v735_v36, 0.0  ;;  %v2158_v38 = vpack.i.bf16 %v2635_v26, %v2629_v20 }
 0x200   : > { %v2125_v1 = vpop.permute.xlu0 %2124  ;;  %v775_v41 = vrot.slane %v738_v39, 4  ;;  %v776_v42 = vrot.slane %v739_v40, 4  ;;  %v2604_v48 = vsel %vm438_vm6, %v738_v39, %v2549_v9  ;;  %v2612_v56 = vsel %vm438_vm6, %v739_v40, %v2552_v10 }
 0x201   : > { %v2010_v55 = vpack.c.bf16 %v2604_v48, %v2597_v44  ;;  %v2008_v62 = vpack.c.bf16 %v2612_v56, %v2591_v43  ;;  %v744_v21 = vsel %vm368_vm9, %v741_v12, %v743_v2  ;;  %v2127_v24 = vunpack.i.h.bf16 %v2125_v1 }
 0x202   : > { %2144 = vrot.lane.b32.xlu1 %v2103_v4, %s2314_s13  ;;  %v2133_v45 = vpack.i.bf16 %v776_v42, %v775_v41  ;;  %v745_v4 = vsel %vm368_vm9, %v743_v2, %v2469_v54  ;;  %v2126_v25 = vunpack.i.l.bf16 %v2125_v1  ;;  %v596_v12 = vsel %vm2428_vm1, %v592_v18, 0.0 }
 0x203   : > { %v2606_v52 = vpop.permute.xlu1 %615  ;;  %v2639_v27 = vsel %vm2444_vm8, %v745_v4, 0.0  ;;  %v2650_v36 = vsel %vm2439_vm7, %v744_v21, 0.0  ;;  %v622_v42 = vrot.slane %v596_v12, 4 }
 0x204   : > { %2134 = vrot.lane.b32.xlu0 %v2133_v45, %s2314_s13  ;;  %v2130_v58 = vpop.permute.xlu0 %2129  ;;  %v617_v2 = vsel %vm410_vm4, %v2606_v52, %v2126_v25  ;;  %v612_v1 = vsel %vm410_vm4, %v2126_v25, %v2127_v24  ;;  %v621_v45 = vrot.slane %v595_v28, 4  ;;  %v611_v51 = vsel %vm410_vm4, %v2462_v49, %v2126_v25 }
 0x205   : > { %v2132_v5 = vunpack.i.h.bf16 %v2130_v58  ;;  %v2131_v8 = vunpack.i.l.bf16 %v2130_v58 }
 0x206   : > { %2154 = vrot.lane.b32.xlu1 %v2153_v59, %s2313_s12  ;;  %v632_v59 = vsel %vm438_vm6, %v612_v1, %v622_v42 }
 0x207   : > { %v2625_v19 = vpop.permute.xlu1 %767  ;;  %v602_v29 = vsel %vm355_vm0, %v2131_v8, %v2132_v5  ;;  %v601_v41 = vsel %vm355_vm0, %v2422_v14, %v2131_v8  ;;  %v631_v5 = vsel %vm438_vm6, %v617_v2, %v621_v45  ;;  %v976_v45 = vsel %vm438_vm6, %v595_v28, %v2529_v60 }
 0x208   : > { %2149 = vrot.lane.b32.xlu0 %v2148_v11, %s2314_s13  ;;  %v606_v46 = vsel %vm2428_vm1, %v602_v29, 0.0  ;;  %v605_v18 = vsel %vm2432_vm3, %v601_v41, 0.0  ;;  %v2698_v41 = vld [vmem:[%s3168_s3] sm:$0xf]  ;;  %v769_v28 = vsel %vm433_vm11, %v2575_v31, %v2625_v19 }
 0x209   : > { %v636_v13 = vsel %vm438_vm6, %v606_v46, %v2552_v10  ;;  %v635_v29 = vsel %vm438_vm6, %v605_v18, %v2549_v9 }
 0x20a   : > { %805 = vrot.lane.b32.xlu1 %v2639_v27, %s2314_s13  ;;  %v1988_v25 = vpack.c.bf16 %v636_v13, %v2591_v43  ;;  %v1990_v2 = vpack.c.bf16 %v635_v29, %v2597_v44 }
 0x20b   : > { %v2120_v32 = vpop.permute.xlu1 %2119 }
 0x20c   : > { %v2122_v39 = vunpack.i.h.bf16 %v2120_v32  ;;  %v2121_v40 = vunpack.i.l.bf16 %v2120_v32  ;;  %803 = vrot.lane.b32.xlu0 %v2650_v36, %s2314_s13  ;;  %v968_v32 = vrot.slane %v606_v46, 4 }
 0x20e   : > { %2159 = vrot.lane.b32.xlu1 %v2158_v38, %s2311_s10  ;;  %v582_v47 = vsel %vm325_vm2, %v2121_v40, %v2122_v39  ;;  %v581_v50 = vsel %vm325_vm2, %v2426_v17, %v2121_v40  ;;  %v967_v38 = vrot.slane %v605_v18, 4  ;;  %v979_v39 = vsel %vm438_vm6, %v2532_v61, %v968_v32 }
 0x20f   : > { %v586_v58 = vsel %vm2428_vm1, %v582_v47, 0.0  ;;  %v585_v4 = vsel %vm2432_vm3, %v581_v50, 0.0 }
 0x210   : > { %973 = vrot.lane.b32.xlu0 %v2307_v0, %s2314_s13  ;;  %v630_v8 = vsel %vm438_vm6, %v586_v58, %v612_v1  ;;  %v629_v11 = vsel %vm438_vm6, %v585_v4, %v611_v51  ;;  %v978_v40 = vsel %vm438_vm6, %v2529_v60, %v967_v38  ;;  %v977_v1 = vsel %vm438_vm6, %v596_v12, %v2532_v61 }
 0x211   : > { %v1984_v21 = vpack.c.bf16 %v632_v59, %v630_v8  ;;  %v1986_v24 = vpack.c.bf16 %v631_v5, %v629_v11  ;;  %v2000_v42 = vpack.c.bf16 %v979_v39, %v977_v1  ;;  %v2002_v46 = vpack.c.bf16 %v978_v40, %v976_v45 }
 0x212   : > { %v808_v51 = vsel %vm438_vm6, 0.0, %v2396_v7  ;;  %v971_v45 = vsel %vm433_vm11, %v2625_v19, %v2487_v15 }
 0x213   : > { %1985 = vmatprep.subr.bf16.mxu1 %v1984_v21 }
 0x214   : > { %1987 = vmatpush1.bf16.msra.mxu1 %v1986_v24 }
 0x215   : > { %1989 = vmatprep.subr.bf16.mxu1 %v1988_v25 }
 0x218   : > { %1991 = vmatpush1.bf16.msra.mxu1 %v1990_v2 }
 0x219   : > { %1945 = vmatprep.subr.msk.mxu1 %vm438_vm6, %v2552_v10 }
 0x21c   : > { %1946 = vmatpush1.msk.msra.mxu1 %vm438_vm6, %v2549_v9 }
 0x21d   : > { %2001 = vmatprep.subr.bf16.mxu1 %v2000_v42  ;;  %1947 = vmatmul.mubr.msk.f32.vlgmr.msra.gmra.mrb[0].mxu1 %vm461_vm13, %v2698_v41 }
 0x21e   : > { %2003 = vmatpush1.bf16.msra.mxu1 %v2002_v46  ;;  %1050 = vmatprep.mubr.f32.mxu1 %v2307_v0 }
 0x270   : > { %v2140_v12 = vpop.permute.xlu1 %2139 }
 0x271   : > { %v2142_v47 = vunpack.i.h.bf16 %v2140_v12  ;;  %v2141_v50 = vunpack.i.l.bf16 %v2140_v12 }
 0x273   : > { %v761_v58 = vsel %vm433_vm11, %v2141_v50, %v2142_v47  ;;  %v811_v59 = vsel %vm438_vm6, %v2141_v50, %v2575_v31  ;;  %v813_v4 = vsel %vm438_vm6, %v2142_v47, %v2625_v19 }
 0x274   : > { %v2145_v5 = vpop.permute.xlu1 %2144  ;;  %v2163_v8 = vpack.i.bf16 %v811_v59, %v808_v51  ;;  %v812_v11 = vsel %vm438_vm6, %v761_v58, %v769_v28 }
 0x275   : > { %v2168_v13 = vpack.i.bf16 %v813_v4, %v812_v11  ;;  %v2147_v18 = vunpack.i.h.bf16 %v2145_v5  ;;  %v2146_v21 = vunpack.i.l.bf16 %v2145_v5 }
 0x276   : > { %2164 = vrot.lane.b32.xlu1 %v2163_v8, %s2311_s10  ;;  %v2135_v7 = vpop.permute.xlu0 %2134 }
 0x277   : > { %v2137_v24 = vunpack.i.h.bf16 %v2135_v7  ;;  %v2136_v25 = vunpack.i.l.bf16 %v2135_v7  ;;  %2169 = vrot.lane.b32.xlu0 %v2168_v13, %s2311_s10  ;;  %v789_v40 = vsel %vm433_vm11, %v2146_v21, %v2147_v18 }
 0x278   : > { %v2155_v29 = vpop.permute.xlu1 %2154 }
 0x279   : > { %v781_v32 = vsel %vm433_vm11, %v2136_v25, %v2137_v24  ;;  %v2157_v38 = vunpack.i.h.bf16 %v2155_v29  ;;  %v2156_v2 = vunpack.i.l.bf16 %v2155_v29  ;;  %v816_v39 = vsel %vm438_vm6, %v2625_v19, %v2137_v24 }
 0x27a   : > { %v2150_v1 = vpop.permute.xlu0 %2149  ;;  %v815_v42 = vsel %vm438_vm6, %v769_v28, %v781_v32  ;;  %v814_v4 = vsel %vm438_vm6, %v2575_v31, %v2136_v25 }
 0x27b   : > { %v959_v46 = vsel %vm3183_vm10, %v2157_v38, %v2156_v2  ;;  %v960_v12 = vsel %vm3184_vm12, %v2156_v2, %v2481_v6  ;;  %v2152_v47 = vunpack.i.h.bf16 %v2150_v1  ;;  %v2151_v50 = vunpack.i.l.bf16 %v2150_v1 }
 0x27c   : > { %v963_v51 = vsel %vm2432_vm3, %v959_v46, 0.0  ;;  %v2173_v58 = vpack.i.bf16 %v816_v39, %v815_v42  ;;  %v964_v59 = vsel %vm2428_vm1, %v960_v12, 0.0 }
 0x27d   : > { %v797_v5 = vsel %vm433_vm11, %v2151_v50, %v2152_v47  ;;  %v981_v8 = vsel %vm438_vm6, %v964_v59, %v971_v45  ;;  %v819_v11 = vsel %vm438_vm6, %v2147_v18, %v2152_v47  ;;  %v817_v13 = vsel %vm438_vm6, %v2146_v21, %v2151_v50  ;;  %v806_v21 = vpop.permute.xlu1 %805 }
 0x27e   : > { %2174 = vrot.lane.b32.xlu0 %v2173_v58, %s2311_s10  ;;  %v804_v7 = vpop.permute.xlu0 %803  ;;  %v2004_v24 = vpack.c.bf16 %v981_v8, %v2635_v26  ;;  %v818_v29 = vsel %vm438_vm6, %v789_v40, %v797_v5  ;;  %v2183_v32 = vpack.i.bf16 %v817_v13, %v814_v4  ;;  %v980_v38 = vsel %vm438_vm6, %v963_v51, %v769_v28 }
 0x27f   : > { %v2178_v2 = vpack.i.bf16 %v819_v11, %v818_v29  ;;  %v2006_v31 = vpack.c.bf16 %v980_v38, %v2629_v20  ;;  %v807_v25 = vsel %vm433_vm11, %v804_v7, %v806_v21  ;;  %v2188_v20 = vpack.i.bf16 %v626_v33, %v2526_v57 }
 0x280   : > { %2005 = vmatprep.subr.bf16.mxu1 %v2004_v24 }
 0x281   : > { %2179 = vrot.lane.b32.xlu1 %v2178_v2, %s2311_s10  ;;  %2007 = vmatpush1.bf16.msra.mxu1 %v2006_v31  ;;  %v2160_v61 = vpop.permute.xlu1 %2159 }
 0x282   : > { %2184 = vrot.lane.b32.xlu0 %v2183_v32, %s2311_s10  ;;  %v2748_v18 = vpop.permute.xlu0 %973  ;;  %v2162_v33 = vunpack.i.h.bf16 %v2160_v61  ;;  %v2161_v39 = vunpack.i.l.bf16 %v2160_v61 }
 0x283   : > { %v975_v26 = vsel %vm433_vm11, %v2625_v19, %v2748_v18  ;;  %v2193_v19 = vpack.i.bf16 %v625_v35, %v2524_v53 }
 0x284   : > { %1951 = vmatprep.subr.msk.mxu1 %vm438_vm6, %v975_v26  ;;  %v863_v47 = vsel %vm410_vm4, %v2161_v39, %v2162_v33 }
 0x285   : > { %858 = vrot.lane.b32.xlu1 %v807_v25, %s2311_s10  ;;  %1952 = vmatpush1.msk.msra.mxu1 %vm438_vm6, %v769_v28  ;;  %v564_v28 = vld [vmem:[%s3169_s4] sm:$0xf] }
 0x286   : > { %860 = vrot.lane.b32.xlu0 %v806_v21, %s2311_s10  ;;  %1953 = vmatmul.mubr.msk.f32.vlgmr.msra.gmra.mrb[2].mxu1 %vm461_vm13, %v2698_v41 }
 0x287   : > { %1346 = vmatprep.mubr.f32.mxu1 %v2307_v0 }
 0x289   : > { %856 = vrot.lane.b32.xlu1 %v804_v7, %s2311_s10 }
 0x28a   : > { %2189 = vrot.lane.b32.xlu0 %v2188_v20, %s2314_s13 }
 0x28d   : > { %2194 = vrot.lane.b32.xlu1 %v2193_v19, %s2314_s13 }
 0x28e   : > { %1059 = vrot.lane.b32.xlu0 %v2526_v57, %s2315_s14 }
 0x291   : > { %1057 = vrot.lane.b32.xlu1 %v2524_v53, %s2315_s14 }
 0x292   : > { %639 = vperm.xlu0 %2102, %v564_v28  }
 0x2e8   : > { %v2777_v40 = vpop.permute.xlu1 %2164 }
 0x2e9   : > { %v2167_v60 = vunpack.i.h.bf16 %v2777_v40  ;;  %v2166_v35 = vunpack.i.l.bf16 %v2777_v40  ;;  %v2170_v1 = vpop.permute.xlu0 %2169 }
 0x2ea   : > { %v2172_v42 = vunpack.i.h.bf16 %v2170_v1  ;;  %v2171_v45 = vunpack.i.l.bf16 %v2170_v1 }
 0x2eb   : > { %v862_v46 = vsel %vm410_vm4, %v2166_v35, %v2161_v39  ;;  %v1068_v39 = vrot.slane %v2639_v27, 4 }
 0x2ec   : > { %v864_v12 = vsel %vm410_vm4, %v2167_v60, %v2171_v45  ;;  %v865_v50 = vsel %vm410_vm4, %v2171_v45, %v2172_v42 }
 0x2ed   : > { %v1994_v51 = vpack.c.bf16 %v864_v12, %v862_v46  ;;  %v1992_v58 = vpack.c.bf16 %v865_v50, %v863_v47  ;;  %v1067_v46 = vrot.slane %v2650_v36, 4  ;;  %v1090_v36 = vsel %vm438_vm6, %v2552_v10, %v1068_v39 }
 0x2ef   : > { %1993 = vmatprep.subr.bf16.mxu0 %v1992_v58  ;;  %v1089_v56 = vsel %vm438_vm6, %v2549_v9, %v1067_v46 }
 0x2f0   : > { %v2175_v59 = vpop.permute.xlu0 %2174  ;;  %1995 = vmatpush1.bf16.msra.mxu0 %v1994_v51  ;;  %v715_v4 = vpop.f32.mrb[0].mxu1 }
 0x2f1   : > { %v717_v5 = vpop.f32.mrb[1].mxu1  ;;  %v2177_v8 = vunpack.i.h.bf16 %v2175_v59  ;;  %v2176_v11 = vunpack.i.l.bf16 %v2175_v59 }
 0x2f3   : > { %v2180_v13 = vpop.permute.xlu1 %2179  ;;  %v867_v2 = vsel %vm410_vm4, %v2176_v11, %v2177_v8 }
 0x2f4   : > { %v2182_v7 = vunpack.i.h.bf16 %v2180_v13  ;;  %v2181_v24 = vunpack.i.l.bf16 %v2180_v13  ;;  %v2185_v29 = vpop.permute.xlu0 %2184 }
 0x2f5   : > { %v2187_v32 = vunpack.i.h.bf16 %v2185_v29  ;;  %v2186_v38 = vunpack.i.l.bf16 %v2185_v29 }
 0x2f6   : > { %v869_v31 = vsel %vm410_vm4, %v2181_v24, %v2182_v7 }
 0x2f7   : > { %v868_v21 = vsel %vm410_vm4, %v2187_v32, %v2181_v24  ;;  %v866_v26 = vsel %vm410_vm4, %v2186_v38, %v2176_v11  ;;  %v859_v25 = vpop.permute.xlu1 %858  ;;  %v1996_v20 = vpack.c.bf16 %v869_v31, %v867_v2 }
 0x2f8   : > { %v1998_v19 = vpack.c.bf16 %v868_v21, %v866_v26  ;;  %v861_v28 = vpop.permute.xlu0 %860 }
 0x2f9   : > { %1997 = vmatprep.subr.bf16.mxu0 %v1996_v20  ;;  %v871_v61 = vsel %vm410_vm4, %v859_v25, %v861_v28 }
 0x2fa   : > { %1999 = vmatpush1.bf16.msra.mxu0 %v1998_v19 }
 0x2fb   : > { %v857_v33 = vpop.permute.xlu1 %856  ;;  %1948 = vmatprep.subr.msk.mxu0 %vm438_vm6, %v871_v61 }
 0x2fc   : > { %v870_v60 = vsel %vm410_vm4, %v857_v33, %v859_v25  ;;  %v2190_v1 = vpop.permute.xlu0 %2189 }
 0x2fd   : > { %v2192_v42 = vunpack.i.h.bf16 %v2190_v1  ;;  %v2191_v45 = vunpack.i.l.bf16 %v2190_v1 }
 0x2fe   : > { %1949 = vmatpush1.msk.msra.mxu0 %vm438_vm6, %v870_v60 }
 0x2ff   : > { %v1084_v12 = vsel %vm433_vm11, %v2192_v42, %v2487_v15  ;;  %v1076_v47 = vsel %vm433_vm11, %v2191_v45, %v2748_v18  ;;  %1950 = vmatmul.mubr.msk.f32.vlgmr.msra.gmra.mrb[4].mxu0 %vm461_vm13, %v2698_v41  ;;  %2009 = vmatprep.subr.bf16.mxu0 %v2008_v62  ;;  %v2195_v27 = vpop.permute.xlu1 %2194 }
 0x300   : > { %v1060_v50 = vpop.permute.xlu0 %1059  ;;  %v2197_v51 = vunpack.i.h.bf16 %v2195_v27  ;;  %v2196_v58 = vunpack.i.l.bf16 %v2195_v27  ;;  %2011 = vmatpush1.bf16.msra.mxu0 %v2010_v55  ;;  %v1092_v59 = vsel %vm438_vm6, %v1076_v47, %v1084_v12  ;;  %1163 = vmatprep.mubr.f32.mxu0 %v2307_v0 }
 0x301   : > { %v2012_v8 = vpack.c.bf16 %v1092_v59, %v1090_v36  ;;  %v1062_v62 = vsel %vm3185_vm14, %v1060_v50, %v2503_v37 }
 0x302   : > { %v1083_v11 = vsel %vm433_vm11, %v2197_v51, %v2192_v42  ;;  %v1075_v43 = vsel %vm433_vm11, %v2196_v58, %v2191_v45  ;;  %v1066_v55 = vsel %vm2444_vm8, %v1062_v62, 0.0 }
 0x303   : > { %2013 = vmatprep.subr.bf16.mxu0 %v2012_v8  ;;  %v1058_v44 = vpop.permute.xlu1 %1057  ;;  %v1091_v48 = vsel %vm438_vm6, %v1075_v43, %v1083_v11 }
 0x304   : > { %v2014_v10 = vpack.c.bf16 %v1091_v48, %v1089_v56  ;;  %v1061_v13 = vsel %vm3186_vm15, %v1058_v44, %v1060_v50 }
 0x305   : > { %v1065_v7 = vsel %vm2439_vm7, %v1061_v13, 0.0 }
 0x306   : > { %2015 = vmatpush1.bf16.msra.mxu0 %v2014_v10 }
 0x307   : > { %1954 = vmatprep.subr.msk.mxu0 %vm438_vm6, %v1066_v55 }
 0x30a   : > { %1955 = vmatpush1.msk.msra.mxu0 %vm438_vm6, %v1065_v7 }
 0x30b   : > { %1956 = vmatmul.mubr.msk.f32.vlgmr.msra.gmra.mrb[6].mxu0 %vm461_vm13, %v2698_v41 }
 0x30c   : > { %1588 = vmatprep.mubr.f32.mxu0 %v2307_v0 }
 0x311   : > { %v2830_v9 = vpop.permute.xlu0 %639 }
 0x312   : > { %v718_v24 = vadd.f32 %v717_v5, %v2830_v9  ;;  %v716_v29 = vadd.f32 %v715_v4, %v2830_v9 }
 0x314   : > { %vm1171_vm10 = vcmp.ge.f32.partialorder %v718_v24, 0.0  ;;  %v1173_v32 = vmul.f32 0.2, %v718_v24  ;;  %vm1170_vm12 = vcmp.ge.f32.partialorder %v716_v29, 0.0  ;;  %v1172_v38 = vmul.f32 0.2, %v716_v29 }
 0x316   : > { %v2834_v2 = vsel %vm1171_vm10, %v718_v24, %v1173_v32  ;;  %v2836_v31 = vsel %vm1170_vm12, %v716_v29, %v1172_v38 }
 0x317   : > { %v2203_v21 = vpack.i.bf16 %v2834_v2, %v2836_v31  ;;  %v1399_v28 = vrot.slane %v2836_v31, 4  ;;  %v1400_v61 = vrot.slane %v2834_v2, 4 }
 0x319   : > { %2204 = vrot.lane.b32.xlu0 %v2203_v21, %s2312_s11  ;;  %v2208_v60 = vpack.i.bf16 %v1400_v61, %v1399_v28 }
 0x359   : > { %v1052_v41 = vpop.f32.mrb[2].mxu1 }
 0x35a   : > { %v1053_v26 = vadd.f32 %v1052_v41, %v2830_v9  ;;  %v1054_v25 = vpop.f32.mrb[3].mxu1 }
 0x35b   : > { %v1055_v5 = vadd.f32 %v1054_v25, %v2830_v9 }
 0x35c   : > { %vm1182_vm14 = vcmp.ge.f32.partialorder %v1053_v26, 0.0  ;;  %v1184_v4 = vmul.f32 0.2, %v1053_v26 }
 0x35d   : > { %vm1183_vm15 = vcmp.ge.f32.partialorder %v1055_v5, 0.0  ;;  %v1185_v20 = vmul.f32 0.2, %v1055_v5 }
 0x35e   : > { %v2843_v19 = vsel %vm1182_vm14, %v1053_v26, %v1184_v4 }
 0x35f   : > { %v2847_v33 = vsel %vm1183_vm15, %v1055_v5, %v1185_v20 }
 0x360   : > { %1377 = vrot.lane.b32.xlu0 %v2847_v33, %s2312_s11  ;;  %v2198_v39 = vpack.i.bf16 %v2847_v33, %v2843_v19 }
 0x362   : > { %2199 = vrot.lane.b32.xlu1 %v2198_v39, %s2309_s27 }
 0x364   : > { %2209 = vrot.lane.b32.xlu0 %v2208_v60, %s2314_s13 }
 0x366   : > { %1375 = vrot.lane.b32.xlu1 %v2843_v19, %s2312_s11 }
 0x38b   : > { %v2205_v1 = vpop.permute.xlu0 %2204 }
 0x38c   : > { %v2207_v42 = vunpack.i.h.bf16 %v2205_v1  ;;  %v2206_v45 = vunpack.i.l.bf16 %v2205_v1 }
 0x38e   : > { %v1370_v46 = vsel %vm368_vm9, %v2207_v42, %v2469_v54  ;;  %v1369_v12 = vsel %vm368_vm9, %v2206_v45, %v2207_v42  ;;  %v2911_v42 = vrot.slane %v2847_v33, 4 }
 0x38f   : > { %v2866_v47 = vsel %vm2439_vm7, %v1369_v12, 0.0  ;;  %v2870_v27 = vsel %vm2444_vm8, %v1370_v46, 0.0 }
 0x390   : > { %v1419_v50 = vrot.slane %v2866_v47, 4  ;;  %v1420_v51 = vrot.slane %v2870_v27, 4 }
 0x392   : > { %v2213_v58 = vpack.i.bf16 %v1420_v51, %v1419_v50 }
 0x394   : > { %2214 = vrot.lane.b32.xlu1 %v2213_v58, %s2314_s13 }
 0x3d2   : > { %v950_v36 = vpop.f32.mrb[4].mxu0  ;;  %v1378_v38 = vpop.permute.xlu0 %1377 }
 0x3d3   : > { %v952_v59 = vpop.f32.mrb[5].mxu0  ;;  %v951_v44 = vadd.f32 %v950_v36, %v2830_v9 }
 0x3d4   : > { %v953_v8 = vadd.f32 %v952_v59, %v2830_v9  ;;  %v2200_v11 = vpop.permute.xlu1 %2199  ;;  %v1380_v59 = vsel %vm368_vm9, %v1378_v38, %v2469_v54 }
 0x3d5   : > { %v2202_v43 = vunpack.i.h.bf16 %v2200_v11  ;;  %v2201_v56 = vunpack.i.l.bf16 %v2200_v11  ;;  %v1178_v32 = vmul.f32 0.2, %v951_v44  ;;  %vm1176_vm12 = vcmp.ge.f32.partialorder %v951_v44, 0.0 }
 0x3d6   : > { %vm1177_vm10 = vcmp.ge.f32.partialorder %v953_v8, 0.0  ;;  %v1179_v62 = vmul.f32 0.2, %v953_v8  ;;  %v2936_v11 = vsel %vm2444_vm8, %v1380_v59, 0.0  ;;  %v2210_v54 = vpop.permute.xlu0 %2209 }
 0x3d7   : > { %v1357_v48 = vsel %vm342_vm5, %v2424_v16, %v2201_v56  ;;  %v1358_v55 = vsel %vm342_vm5, %v2201_v56, %v2202_v43  ;;  %v2891_v41 = vsel %vm1176_vm12, %v951_v44, %v1178_v32  ;;  %v2948_v56 = vunpack.i.h.bf16 %v2210_v54 }
 0x3d8   : > { %v2879_v10 = vsel %vm1177_vm10, %v953_v8, %v1179_v62  ;;  %v1361_v13 = vsel %vm2439_vm7, %v1357_v48, 0.0  ;;  %v1362_v7 = vsel %vm2444_vm8, %v1358_v55, 0.0  ;;  %v1376_v24 = vpop.permute.xlu1 %1375  ;;  %v2211_v62 = vunpack.i.l.bf16 %v2210_v54 }
 0x3d9   : > { %1411 = vrot.lane.b32.xlu0 %v2879_v10, %s2314_s13  ;;  %v2218_v29 = vpack.i.bf16 %v1362_v7, %v1361_v13  ;;  %v1379_v16 = vsel %vm368_vm9, %v1376_v24, %v1378_v38  ;;  %v2233_v1 = vpack.i.bf16 %v2879_v10, %v2891_v41 }
 0x3da   : > { %v2899_v4 = vsel %vm2439_vm7, %v1379_v16, 0.0 }
 0x3db   : > { %2219 = vrot.lane.b32.xlu1 %v2218_v29, %s2314_s13  ;;  %v2952_v29 = vsel %vm433_vm11, %v2211_v62, %v2948_v56 }
 0x3dd   : > { %2224 = vrot.lane.b32.xlu0 %v2198_v39, %s2314_s13 }
 0x3de   : > { %v1165_v21 = vpop.f32.mrb[6].mxu0 }
 0x3df   : > { %v1166_v26 = vadd.f32 %v1165_v21, %v2830_v9  ;;  %v1167_v25 = vpop.f32.mrb[7].mxu0  ;;  %1409 = vrot.lane.b32.xlu1 %v2891_v41, %s2314_s13 }
 0x3e0   : > { %v1168_v5 = vadd.f32 %v1167_v25, %v2830_v9  ;;  %v2908_v9 = vrot.slane %v2843_v19, 4 }
 0x3e1   : > { %vm1188_vm5 = vcmp.ge.f32.partialorder %v1166_v26, 0.0  ;;  %v1190_v20 = vmul.f32 0.2, %v1166_v26  ;;  %1447 = vrot.lane.b32.xlu0 %v2899_v4, %s2314_s13 }
 0x3e2   : > { %vm1189_vm14 = vcmp.ge.f32.partialorder %v1168_v5, 0.0  ;;  %v1191_v39 = vmul.f32 0.2, %v1168_v5  ;;  %v2243_v51 = vpack.i.bf16 %v2911_v42, %v2908_v9 }
 0x3e3   : > { %v2903_v60 = vsel %vm1188_vm5, %v1166_v26, %v1190_v20 }
 0x3e4   : > { %v2913_v45 = vsel %vm1189_vm14, %v1168_v5, %v1191_v39  ;;  %v1385_v46 = vrot.slane %v2903_v60, 4 }
 0x3e5   : > { %2234 = vrot.lane.b32.xlu0 %v2233_v1, %s2308_s26  ;;  %v1386_v12 = vrot.slane %v2913_v45, 4 }
 0x3e6   : > { %v2922_v58 = vsel %vm438_vm6, %v2843_v19, %v1385_v46  ;;  %v2238_v19 = vpack.i.bf16 %v2913_v45, %v2903_v60 }
 0x3e7   : > { %v2228_v50 = vpack.i.bf16 %v1386_v12, %v1385_v46  ;;  %v2926_v36 = vsel %vm438_vm6, %v2847_v33, %v1386_v12 }
 0x3e8   : > { %v2258_v8 = vpack.i.bf16 %v2926_v36, %v2922_v58 }
 0x3e9   : > { %2229 = vrot.lane.b32.xlu1 %v2228_v50, %s2314_s13  ;;  %2244 = vrot.lane.b32.xlu0 %v2243_v51, %s2311_s10 }
 0x3ed   : > { %1449 = vrot.lane.b32.xlu1 %v2936_v11, %s2314_s13  ;;  %2259 = vrot.lane.b32.xlu0 %v2258_v8, %s2311_s10 }
 0x3f1   : > { %2239 = vrot.lane.b32.xlu1 %v2238_v19, %s2310_s28 }
 0x3f5   : > { %2249 = vrot.lane.b32.xlu1 %v2238_v19, %s2311_s10 }
 0x3f9   : > { %2254 = vrot.lane.b32.xlu1 %v2238_v19, %s2308_s26 }
 0x406   : > { %v2215_v33 = vpop.permute.xlu1 %2214 }
 0x407   : > { %v2217_v48 = vunpack.i.h.bf16 %v2215_v33  ;;  %v2216_v55 = vunpack.i.l.bf16 %v2215_v33 }
 0x409   : > { %v1425_v25 = vsel %vm433_vm11, %v2216_v55, %v2217_v48 }
 0x44b   : > { %v2946_v43 = vpop.permute.xlu0 %1411 }
 0x44d   : > { %v2220_v44 = vpop.permute.xlu1 %2219 }
 0x44e   : > { %v2222_v13 = vunpack.i.h.bf16 %v2220_v44  ;;  %v2221_v7 = vunpack.i.l.bf16 %v2220_v44 }
 0x44f   : > { %v2225_v24 = vpop.permute.xlu0 %2224 }
 0x450   : > { %v1395_v32 = vsel %vm433_vm11, %v2221_v7, %v2222_v13  ;;  %v1456_v38 = vsel %vm438_vm6, %v2222_v13, %v2948_v56  ;;  %v1454_v1 = vsel %vm438_vm6, %v2221_v7, %v2211_v62  ;;  %v2227_v12 = vunpack.i.h.bf16 %v2225_v24 }
 0x451   : > { %v1410_v16 = vpop.permute.xlu1 %1409  ;;  %v1455_v21 = vsel %vm438_vm6, %v1395_v32, %v2952_v29  ;;  %v2226_v50 = vunpack.i.l.bf16 %v2225_v24 }
 0x452   : > { %v2961_v26 = vsel %vm433_vm11, %v1410_v16, %v2946_v43  ;;  %v2263_v5 = vpack.i.bf16 %v1456_v38, %v1455_v21  ;;  %v1457_v33 = vsel %vm438_vm6, %v1410_v16, %v2216_v55  ;;  %v1459_v38 = vsel %vm438_vm6, %v2946_v43, %v2217_v48 }
 0x453   : > { %v1458_v20 = vsel %vm438_vm6, %v2961_v26, %v1425_v25  ;;  %v1448_v39 = vpop.permute.xlu0 %1447  ;;  %v1433_v54 = vsel %vm433_vm11, %v2226_v50, %v2227_v12 }
 0x454   : > { %2264 = vrot.lane.b32.xlu1 %v2263_v5, %s2311_s10  ;;  %v2268_v46 = vpack.i.bf16 %v1458_v20, %v1454_v1 }
 0x456   : > { %2269 = vrot.lane.b32.xlu0 %v2268_v46, %s2311_s10 }
 0x457   : > { %v2235_v51 = vpop.permute.xlu0 %2234 }
 0x458   : > { %v2237_v44 = vunpack.i.h.bf16 %v2235_v51  ;;  %v2236_v13 = vunpack.i.l.bf16 %v2235_v51 }
 0x45a   : > { %v1214_v55 = vsel %vm355_vm0, %v2422_v14, %v2236_v13  ;;  %v1215_v16 = vsel %vm355_vm0, %v2236_v13, %v2237_v44  ;;  %v1256_v13 = vrot.slane %v2891_v41, 4 }
 0x45b   : > { %v2230_v59 = vpop.permute.xlu1 %2229  ;;  %v2245_v20 = vpop.permute.xlu0 %2244  ;;  %v1219_v51 = vsel %vm2428_vm1, %v1215_v16, 0.0 }
 0x45c   : > { %v2232_v8 = vunpack.i.h.bf16 %v2230_v59  ;;  %v2231_v19 = vunpack.i.l.bf16 %v2230_v59  ;;  %v1257_v59 = vrot.slane %v2879_v10, 4 }
 0x45e   : > { %v1441_v32 = vsel %vm433_vm11, %v2231_v19, %v2232_v8  ;;  %v1460_v62 = vsel %vm438_vm6, %v2226_v50, %v2231_v19  ;;  %v1462_v7 = vsel %vm438_vm6, %v2227_v12, %v2232_v8  ;;  %v2986_v50 = vsel %vm2432_vm3, %v1214_v55, 0.0 }
 0x45f   : > { %v1450_v24 = vpop.permute.xlu1 %1449  ;;  %1490 = vrot.lane.b32.xlu0 %v1460_v62, %s2311_s10  ;;  %v2273_v21 = vpack.i.bf16 %v1457_v33, %v1462_v7  ;;  %v1461_v25 = vsel %vm438_vm6, %v1433_v54, %v1441_v32  ;;  %v2247_v8 = vunpack.i.h.bf16 %v2245_v20  ;;  %v2246_v19 = vunpack.i.l.bf16 %v2245_v20 }
 0x460   : > { %v2278_v5 = vpack.i.bf16 %v1461_v25, %v1459_v38  ;;  %v1451_v12 = vsel %vm433_vm11, %v1448_v39, %v1450_v24  ;;  %v1253_v25 = vrot.slane %v1219_v51, 4 }
 0x461   : > { %2274 = vrot.lane.b32.xlu1 %v2273_v21, %s2311_s10  ;;  %v1252_v21 = vrot.slane %v2986_v50, 4  ;;  %v1239_v55 = vsel %vm410_vm4, %v2246_v19, %v2247_v8 }
 0x463   : > { %v2240_v1 = vpop.permute.xlu1 %2239  ;;  %2279 = vrot.lane.b32.xlu0 %v2278_v5, %s2311_s10  ;;  %v1238_v5 = vsel %vm410_vm4, %v2462_v49, %v2246_v19 }
 0x464   : > { %v2242_v46 = vunpack.i.h.bf16 %v2240_v1  ;;  %v2241_v48 = vunpack.i.l.bf16 %v2240_v1 }
 0x465   : > { %1498 = vrot.lane.b32.xlu1 %v1451_v12, %s2311_s10 }
 0x466   : > { %v1202_v54 = vsel %vm325_vm2, %v2426_v17, %v2241_v48  ;;  %v1203_v33 = vsel %vm325_vm2, %v2241_v48, %v2242_v46  ;;  %v2283_v17 = vpack.i.bf16 %v1257_v59, %v2834_v2 }
 0x467   : > { %v2250_v44 = vpop.permute.xlu1 %2249  ;;  %1500 = vrot.lane.b32.xlu0 %v1450_v24, %s2311_s10  ;;  %v1206_v32 = vsel %vm2432_vm3, %v1202_v54, 0.0  ;;  %v1207_v38 = vsel %vm2428_vm1, %v1203_v33, 0.0  ;;  %v2288_v24 = vpack.i.bf16 %v2891_v41, %v2879_v10 }
 0x468   : > { %v2252_v62 = vunpack.i.h.bf16 %v2250_v44  ;;  %v2251_v7 = vunpack.i.l.bf16 %v2250_v44  ;;  %v1262_v48 = vsel %vm438_vm6, %v1206_v32, %v1238_v5 }
 0x469   : > { %1496 = vrot.lane.b32.xlu1 %v1448_v39, %s2311_s10  ;;  %v1263_v39 = vsel %vm438_vm6, %v1207_v38, %v1239_v55  ;;  %v3033_v38 = vsel %vm438_vm6, %v2834_v2, %v1257_v59  ;;  %v1195_v59 = vld [vmem:[%s3171_s6] sm:$0xf]  ;;  %s1975_s10 = sshll.u32 %s3192_s25, 5 }
 0x46a   : > { %v1246_v16 = vsel %vm410_vm4, %v2606_v52, %v2251_v7  ;;  %v1247_v20 = vsel %vm410_vm4, %v2251_v7, %v2252_v62  ;;  %v2293_v52 = vpack.i.bf16 %v1256_v13, %v2836_v31  ;;  %v3029_v7 = vsel %vm438_vm6, %v2836_v31, %v1256_v13 }
 0x46b   : > { %v2255_v1 = vpop.permute.xlu1 %2254  ;;  %2284 = vrot.lane.b32.xlu0 %v2283_v17, %s2314_s13  ;;  %v1265_v46 = vsel %vm438_vm6, %v1247_v20, %v1253_v25  ;;  %v1264_v12 = vsel %vm438_vm6, %v1246_v16, %v1252_v21  ;;  %v3057_v16 = vld [vmem:[%s3170_s5] sm:$0xf]  ;;  %v1617_v20 = vsel %vm438_vm6, %v1219_v51, %v1400_v61 }
 0x46c   : > { %v2257_v54 = vunpack.i.h.bf16 %v2255_v1  ;;  %v2256_v49 = vunpack.i.l.bf16 %v2255_v1  ;;  %v2016_v33 = vpack.c.bf16 %v1265_v46, %v1263_v39  ;;  %v2018_v8 = vpack.c.bf16 %v1264_v12, %v1262_v48 }
 0x46d   : > { %2289 = vrot.lane.b32.xlu1 %v2288_v24, %s2313_s12 }
 0x46e   : > { %v1224_v19 = vsel %vm355_vm0, %v2422_v14, %v2256_v49  ;;  %v1225_v44 = vsel %vm355_vm0, %v2256_v49, %v2257_v54  ;;  %2017 = vmatprep.subr.bf16.mxu1 %v2016_v33  ;;  %vm3187_vm0 = vcmask 924672  }
 0x46f   : > { %v1228_v62 = vsel %vm2432_vm3, %v1224_v19, 0.0  ;;  %2019 = vmatpush1.bf16.msra.mxu1 %v2018_v8  ;;  %2294 = vrot.lane.b32.xlu0 %v2293_v52, %s2314_s13  ;;  %v1229_v32 = vsel %vm2428_vm1, %v1225_v44, 0.0  ;;  %vm3188_vm2 = vmmov %vm3187_vm0  ;;  %s3150_s13 = scalar_lea.vmem %s3172_s7, %s1975_s10 }
 0x470   : > { %v1269_v14 = vsel %vm438_vm6, %v1229_v32, %v2911_v42  ;;  %v1610_v21 = vrot.slane %v1229_v32, 4  ;;  %v1268_v25 = vsel %vm438_vm6, %v1228_v62, %v2908_v9  ;;  %v1609_v17 = vrot.slane %v1228_v62, 4 }
 0x471   : > { %1699 = vrot.lane.b32.xlu1 %v2834_v2, %s2315_s14  ;;  %v2020_v24 = vpack.c.bf16 %v1269_v14, %v3033_v38  ;;  %v2022_v13 = vpack.c.bf16 %v1268_v25, %v3029_v7  ;;  %v2260_v2 = vpop.permute.xlu0 %2259 }
 0x472   : > { %v1619_v5 = vsel %vm438_vm6, %v2879_v10, %v1610_v21  ;;  %v1618_v55 = vsel %vm438_vm6, %v2891_v41, %v1609_v17  ;;  %v1616_v10 = vsel %vm438_vm6, %v2986_v50, %v1399_v28  ;;  %v2262_v41 = vunpack.i.h.bf16 %v2260_v2 }
 0x473   : > { %2021 = vmatprep.subr.bf16.mxu1 %v2020_v24  ;;  %1697 = vrot.lane.b32.xlu0 %v2836_v31, %s2315_s14  ;;  %v2032_v1 = vpack.c.bf16 %v1619_v5, %v1617_v20  ;;  %v2034_v39 = vpack.c.bf16 %v1618_v55, %v1616_v10  ;;  %v2261_v61 = vunpack.i.l.bf16 %v2260_v2 }
 0x474   : > { %2023 = vmatpush1.bf16.msra.mxu1 %v2022_v13 }
 0x475   : > { %1272 = vperm.xlu1 %2101, %v1195_v59   ;;  %1957 = vmatprep.subr.msk.mxu1 %vm438_vm6, %v2913_v45  ;;  %v1503_v28 = vsel %vm410_vm4, %v2261_v61, %v2262_v41  ;;  %v1502_v49 = vsel %vm410_vm4, %v2166_v35, %v2261_v61  ;;  %v1728_v41 = vsel %vm438_vm6, %v2870_v27, %v2911_v42 }
 0x476   : > { %v1727_v61 = vsel %vm438_vm6, %v2866_v47, %v2908_v9  ;;  %v1707_v47 = vrot.slane %v2899_v4, 4  ;;  %v1613_v4 = vsel %vm433_vm11, %v2948_v56, %v2487_v15 }
 0x478   : > { %1958 = vmatpush1.msk.msra.mxu1 %vm438_vm6, %v2903_v60 }
 0x479   : > { %1959 = vmatmul.mubr.msk.f32.vlgmr.msra.gmra.mrb[4].mxu1 %vm461_vm13, %v3057_v16  ;;  %2033 = vmatprep.subr.bf16.mxu1 %v2032_v1 }
 0x47a   : > { %2035 = vmatpush1.bf16.msra.mxu1 %v2034_v39  ;;  %1690 = vmatprep.mubr.f32.mxu1 %v2307_v0 }
 0x4c6   : > { %v2265_v51 = vpop.permute.xlu1 %2264 }
 0x4c7   : > { %v2267_v46 = vunpack.i.h.bf16 %v2265_v51  ;;  %v2266_v31 = vunpack.i.l.bf16 %v2265_v51  ;;  %v1708_v51 = vrot.slane %v2936_v11, 4 }
 0x4c8   : > { %v2270_v48 = vpop.permute.xlu0 %2269 }
 0x4c9   : > { %v2271_v12 = vunpack.i.l.bf16 %v2270_v48  ;;  %v1505_v50 = vsel %vm410_vm4, %v2266_v31, %v2267_v46  ;;  %v2272_v32 = vunpack.i.h.bf16 %v2270_v48  ;;  %v2040_v48 = vpack.c.bf16 %v1728_v41, %v3033_v38 }
 0x4ca   : > { %v2024_v54 = vpack.c.bf16 %v1505_v50, %v1503_v28  ;;  %v1730_v11 = vsel %vm438_vm6, %v2913_v45, %v1708_v51 }
 0x4cb   : > { %v1504_v33 = vsel %vm410_vm4, %v2271_v12, %v2266_v31  ;;  %v2042_v12 = vpack.c.bf16 %v1727_v61, %v3029_v7 }
 0x4cc   : > { %v2026_v8 = vpack.c.bf16 %v1504_v33, %v1502_v49  ;;  %2025 = vmatprep.subr.bf16.mxu0 %v2024_v54 }
 0x4ce   : > { %2027 = vmatpush1.bf16.msra.mxu0 %v2026_v8 }
 0x4d1   : > { %v1491_v52 = vpop.permute.xlu0 %1490 }
 0x4d3   : > { %v2275_v19 = vpop.permute.xlu1 %2274 }
 0x4d4   : > { %v2277_v44 = vunpack.i.h.bf16 %v2275_v19  ;;  %v2276_v14 = vunpack.i.l.bf16 %v2275_v19 }
 0x4d5   : > { %v2280_v62 = vpop.permute.xlu0 %2279 }
 0x4d6   : > { %v2282_v21 = vunpack.i.h.bf16 %v2280_v62  ;;  %v2281_v25 = vunpack.i.l.bf16 %v2280_v62  ;;  %v1506_v24 = vsel %vm410_vm4, %v2277_v44, %v2272_v32 }
 0x4d7   : > { %v1499_v17 = vpop.permute.xlu1 %1498 }
 0x4d8   : > { %v1508_v40 = vsel %vm410_vm4, %v1491_v52, %v2282_v21  ;;  %v1507_v35 = vsel %vm410_vm4, %v2272_v32, %v2281_v25  ;;  %v1509_v13 = vsel %vm410_vm4, %v2282_v21, %v2276_v14 }
 0x4d9   : > { %v2030_v59 = vpack.c.bf16 %v1508_v40, %v1506_v24  ;;  %v1501_v5 = vpop.permute.xlu0 %1500  ;;  %v2028_v55 = vpack.c.bf16 %v1509_v13, %v1507_v35 }
 0x4da   : > { %v1511_v1 = vsel %vm410_vm4, %v1499_v17, %v1501_v5 }
 0x4db   : > { %v1497_v20 = vpop.permute.xlu1 %1496  ;;  %2029 = vmatprep.subr.bf16.mxu0 %v2028_v55 }
 0x4dc   : > { %2031 = vmatpush1.bf16.msra.mxu0 %v2030_v59  ;;  %v1510_v46 = vsel %vm410_vm4, %v1497_v20, %v1499_v17  ;;  %vm3189_vm4 = vcmask 908288  }
 0x4dd   : > { %v2285_v10 = vpop.permute.xlu0 %2284  ;;  %1960 = vmatprep.subr.msk.mxu0 %vm438_vm6, %v1511_v1 }
 0x4de   : > { %v2287_v39 = vunpack.i.h.bf16 %v2285_v10  ;;  %v2286_v2 = vunpack.i.l.bf16 %v2285_v10 }
 0x4df   : > { %v2290_v31 = vpop.permute.xlu1 %2289 }
 0x4e0   : > { %v1724_v28 = vsel %vm433_vm11, %v2287_v39, %v2487_v15  ;;  %v1716_v50 = vsel %vm433_vm11, %v2286_v2, %v2748_v18  ;;  %v2292_v27 = vunpack.i.h.bf16 %v2290_v31  ;;  %v2291_v42 = vunpack.i.l.bf16 %v2290_v31  ;;  %1961 = vmatpush1.msk.msra.mxu0 %vm438_vm6, %v1510_v46 }
 0x4e1   : > { %v2295_v9 = vpop.permute.xlu0 %2294  ;;  %1962 = vmatmul.mubr.msk.f32.vlgmr.msra.gmra.mrb[8].mxu0 %vm461_vm13, %v3057_v16  ;;  %2041 = vmatprep.subr.bf16.mxu0 %v2040_v48  ;;  %v1732_v7 = vsel %vm438_vm6, %v1716_v50, %v1724_v28 }
 0x4e2   : > { %v1599_v38 = vsel %vm3187_vm0, %v2292_v27, %v2291_v42  ;;  %v1600_v54 = vsel %vm3188_vm2, %v2291_v42, %v2481_v6  ;;  %v2297_v49 = vunpack.i.h.bf16 %v2295_v9  ;;  %v2296_v33 = vunpack.i.l.bf16 %v2295_v9  ;;  %2043 = vmatpush1.bf16.msra.mxu0 %v2042_v12  ;;  %1803 = vmatprep.mubr.f32.mxu0 %v2307_v0 }
 0x4e3   : > { %v1603_v8 = vsel %vm2432_vm3, %v1599_v38, 0.0  ;;  %v1700_v45 = vpop.permute.xlu1 %1699  ;;  %v2044_v52 = vpack.c.bf16 %v1732_v7, %v1730_v11  ;;  %v1604_v19 = vsel %vm2428_vm1, %v1600_v54, 0.0  ;;  %v1729_v6 = vsel %vm438_vm6, %v2903_v60, %v1707_v47  ;;  %vm3190_vm1 = vmmov %vm3189_vm4 }
 0x4e4   : > { %v1715_v44 = vsel %vm433_vm11, %v2296_v33, %v2286_v2  ;;  %v1723_v62 = vsel %vm433_vm11, %v2297_v49, %v2287_v39  ;;  %v1621_v0 = vsel %vm438_vm6, %v1604_v19, %v1613_v4  ;;  %v1702_v15 = vsel %vm3189_vm4, %v1700_v45, %v2503_v37 }
 0x4e5   : > { %2045 = vmatprep.subr.bf16.mxu0 %v2044_v52  ;;  %v1698_v23 = vpop.permute.xlu0 %1697  ;;  %v2036_v56 = vpack.c.bf16 %v1621_v0, %v2926_v36  ;;  %v1620_v22 = vsel %vm438_vm6, %v1603_v8, %v2952_v29  ;;  %v1731_v32 = vsel %vm438_vm6, %v1715_v44, %v1723_v62  ;;  %v1706_v21 = vsel %vm2444_vm8, %v1702_v15, 0.0 }
 0x4e6   : > { %v2038_v60 = vpack.c.bf16 %v1620_v22, %v2922_v58  ;;  %v2046_v14 = vpack.c.bf16 %v1731_v32, %v1729_v6  ;;  %v1701_v25 = vsel %vm3190_vm1, %v1698_v23, %v1700_v45  ;;  %v1615_v37 = vsel %vm433_vm11, %v2946_v43, %v2748_v18 }
 0x4e7   : > { %2037 = vmatprep.subr.bf16.mxu1 %v2036_v56  ;;  %v1705_v58 = vsel %vm2439_vm7, %v1701_v25, 0.0 }
 0x4e8   : > { %2039 = vmatpush1.bf16.msra.mxu1 %v2038_v60  ;;  %2047 = vmatpush1.bf16.msra.mxu0 %v2046_v14 }
 0x4e9   : > { %1963 = vmatprep.subr.msk.mxu1 %vm438_vm6, %v1615_v37  ;;  %1966 = vmatprep.subr.msk.mxu0 %vm438_vm6, %v1706_v21 }
 0x4ec   : > { %1964 = vmatpush1.msk.msra.mxu1 %vm438_vm6, %v2961_v26  ;;  %1967 = vmatpush1.msk.msra.mxu0 %vm438_vm6, %v1705_v58 }
 0x4ed   : > { %1965 = vmatmul.mubr.msk.f32.vlgmr.msra.gmra.mrb[6].mxu1 %vm461_vm13, %v3057_v16  ;;  %1968 = vmatmul.mubr.msk.f32.vlgmr.msra.gmra.mrb[10].mxu0 %vm461_vm13, %v3057_v16 }
 0x4f4   : > { %v1273_v34 = vpop.permute.xlu1 %1272 }
 0x54c   : > { %v1348_v18 = vpop.f32.mrb[4].mxu1 }
 0x54d   : > { %v1349_v36 = vadd.f32 %v1348_v18, %v1273_v34  ;;  %v1350_v43 = vpop.f32.mrb[5].mxu1 }
 0x54e   : > { %v1351_v29 = vadd.f32 %v1350_v43, %v1273_v34 }
 0x54f   : > { %v1810_v17 = vadd.f32 %v1349_v36, %v2524_v53 }
 0x550   : > { %v1811_v30 = vadd.f32 %v1351_v29, %v2526_v57 }
 0x551   : > { %vm1812_vm3 = vcmp.ge.f32.partialorder %v1810_v17, 0.0  ;;  %v1814_v24 = vmul.f32 0.2, %v1810_v17 }
 0x552   : > { %vm1813_vm7 = vcmp.ge.f32.partialorder %v1811_v30, 0.0  ;;  %v1815_v26 = vmul.f32 0.2, %v1811_v30 }
 0x553   : > { %v1816_v40 = vsel %vm1812_vm3, %v1810_v17, %v1814_v24 }
 0x554   : > { %v1817_v16 = vsel %vm1813_vm7, %v1811_v30, %v1815_v26 }
 0x555   : > { %v1820_v35 = vcombine.low %v1816_v40, %v1817_v16 }
 0x557   : > { %1822 = vst [vmem:[%s3150_s13] sm:$0xff] %v1820_v35 }
 0x5b4   : > { %v1590_v13 = vpop.f32.mrb[8].mxu0 }
 0x5b5   : > { %v1591_v59 = vadd.f32 %v1590_v13, %v1273_v34  ;;  %v1592_v5 = vpop.f32.mrb[9].mxu0 }
 0x5b6   : > { %v1593_v55 = vadd.f32 %v1592_v5, %v1273_v34 }
 0x5b7   : > { %v1825_v20 = vrot.slane %v1591_v59, 4 }
 0x5b8   : > { %v1826_v1 = vrot.slane %v1593_v55, 4 }
 0x5b9   : > { %v1829_v10 = vadd.f32 %v1825_v20, %v2524_v53 }
 0x5ba   : > { %v1830_v39 = vadd.f32 %v1826_v1, %v2526_v57 }
 0x5bb   : > { %vm1831_vm6 = vcmp.ge.f32.partialorder %v1829_v10, 0.0  ;;  %v1833_v2 = vmul.f32 0.2, %v1829_v10 }
 0x5bc   : > { %vm1832_vm8 = vcmp.ge.f32.partialorder %v1830_v39, 0.0  ;;  %v1834_v41 = vmul.f32 0.2, %v1830_v39 }
 0x5bd   : > { %v1835_v61 = vsel %vm1831_vm6, %v1829_v10, %v1833_v2 }
 0x5be   : > { %v1836_v51 = vsel %vm1832_vm8, %v1830_v39, %v1834_v41 }
 0x5bf   : > { %v1839_v46 = vcombine.high %v1835_v61, %v1836_v51 }
 0x5c0   : > { %v1692_v31 = vpop.f32.mrb[6].mxu1  ;;  %v1805_v48 = vpop.f32.mrb[10].mxu0 }
 0x5c1   : > { %1969 = vst [vmem:[%s3150_s13 + $0x8] sm:$0xff] %v1839_v46  ;;  %v1693_v12 = vadd.f32 %v1692_v31, %v1273_v34  ;;  %v1806_v28 = vadd.f32 %v1805_v48, %v1273_v34  ;;  %v1694_v50 = vpop.f32.mrb[7].mxu1  ;;  %v1807_v27 = vpop.f32.mrb[11].mxu0 }
 0x5c2   : > { %v1695_v42 = vadd.f32 %v1694_v50, %v1273_v34  ;;  %v1808_v47 = vadd.f32 %v1807_v27, %v1273_v34 }
 0x5c3   : > { %v1843_v53 = vadd.f32 %v1693_v12, %v2534_v63  ;;  %v1859_v9 = vrot.slane %v1806_v28, 4 }
 0x5c4   : > { %v1844_v57 = vadd.f32 %v1695_v42, %v2536_v3  ;;  %v1860_v11 = vrot.slane %v1808_v47, 4 }
 0x5c5   : > { %vm1845_vm9 = vcmp.ge.f32.partialorder %v1843_v53, 0.0  ;;  %v1847_v7 = vmul.f32 0.2, %v1843_v53  ;;  %v1863_v38 = vadd.f32 %v1859_v9, %v2534_v63 }
 0x5c6   : > { %vm1846_vm11 = vcmp.ge.f32.partialorder %v1844_v57, 0.0  ;;  %v1848_v54 = vmul.f32 0.2, %v1844_v57  ;;  %v1864_v49 = vadd.f32 %v1860_v11, %v2536_v3 }
 0x5c7   : > { %v1849_v33 = vsel %vm1845_vm9, %v1843_v53, %v1847_v7  ;;  %vm1865_vm13 = vcmp.ge.f32.partialorder %v1863_v38, 0.0  ;;  %v1867_v4 = vmul.f32 0.2, %v1863_v38 }
 0x5c8   : > { %v1850_v8 = vsel %vm1846_vm11, %v1844_v57, %v1848_v54  ;;  %vm1866_vm15 = vcmp.ge.f32.partialorder %v1864_v49, 0.0  ;;  %v1868_v45 = vmul.f32 0.2, %v1864_v49 }
 0x5c9   : > { %v1869_v52 = vsel %vm1865_vm13, %v1863_v38, %v1867_v4  ;;  %v1853_v19 = vcombine.low %v1849_v33, %v1850_v8 }
 0x5ca   : > { %v1870_v6 = vsel %vm1866_vm15, %v1864_v49, %v1868_v45 }
 0x5cb   : > { %1970 = vst [vmem:[%s3150_s13 + $0x10] sm:$0xff] %v1853_v19  ;;  %v1873_v44 = vcombine.high %v1869_v52, %v1870_v6 }
 0x5cd   : > { %1971 = vst [vmem:[%s3150_s13 + $0x18] sm:$0xff] %v1873_v44 }
 0x5ce PF: > { %s17_s24 = sadd.s32 1, %s2305_s24  }
 0x5cf   : > { %p14_p4 = scmp.ge.s32.totalorder %s17_s24, 4  }
 0x5d1   :  { %16 = sbr.rel (!%p14_p4) target bundleno = 1 (0x1), region = 81 }

</bundles_post_ra>
